<compile_context>
chip_gen: v7x
topology: tpu7x:2x2x1
jax: 0.10.0
libtpu: 0.0.40
codegen_flags: <defaults>
</compile_context>

<pallas_src>
from functools import partial

import jax
import jax.numpy as jnp
from jax.experimental import pallas as pl
from jax.experimental.pallas import tpu as pltpu

EPS = 1e-5
LANE = 128
VMEM_LIMIT_BYTES = 64 * 1024 * 1024   # fits v7x's 64 MiB physical VMEM per TC


def _round_up(x, m):
    return (x + m - 1) // m * m


# ---------------------------------------------------------------------------
# kernels
# ---------------------------------------------------------------------------

def _accumulate_stats(stats_ref, y):
    """Accumulate per-channel [sum; sum_of_squares] across the grid axis."""
    @pl.when(pl.program_id(0) == 0)
    def _init():
        stats_ref[...] = jnp.zeros_like(stats_ref)

    stats_ref[...] += jnp.concatenate(
        [jnp.sum(y, axis=0, keepdims=True),
         jnp.sum(y * y, axis=0, keepdims=True)], axis=0)


def stats1_kernel(p_pad, x_ref, wa_ref, h1p_ref, scp_ref, stats_ref):
    # conv1 and the projection shortcut fused into ONE MXU matmul (shared LHS x):
    #   y = x @ [W1^T | Wsc^T]   -> split into h1_pre and sc_pre.
    y = jnp.dot(x_ref[...], wa_ref[...], preferred_element_type=jnp.float32)
    h1p_ref[...] = y[:, :p_pad]
    scp_ref[...] = y[:, p_pad:]
    _accumulate_stats(stats_ref, y)        # BN1 + BNsc statistics


def stats2_kernel(l, h1p_ref, s1_ref, t1_ref, w2_ref, h2p_ref, stats_ref):
    # Folded BN1 (scale/shift) + ReLU, then the k=3/pad=1 conv as ONE matmul:
    # lane-concat [prev | center | next] against the stacked (3P, P) weight.
    h1 = jnp.maximum(h1p_ref[...] * s1_ref[...] + t1_ref[...], 0.0)
    t = h1.shape[0]
    # Tiles hold whole samples, so neighbor shifts never cross a sample boundary;
    # zero padding at sample edges is applied by masking the first/last row.
    pos = jax.lax.broadcasted_iota(jnp.int32, (t, 1), 0) % l
    prev = jnp.where(pos == 0, 0.0, pltpu.roll(h1, shift=1, axis=0))      # x[l-1]
    nxt = jnp.where(pos == l - 1, 0.0, pltpu.roll(h1, shift=t - 1, axis=0))  # x[l+1]
    cat = jnp.concatenate([prev, h1, nxt], axis=1).astype(w2_ref.dtype)
    h2p = jnp.dot(cat, w2_ref[...], preferred_element_type=jnp.float32)
    h2p_ref[...] = h2p
    _accumulate_stats(stats_ref, h2p)      # BN2 statistics


def stats3_kernel(h2p_ref, s2_ref, t2_ref, w3_ref, h3p_ref, stats_ref):
    # Folded BN2 + ReLU, then conv3 (1x1 == channel matmul).
    h2 = jnp.maximum(h2p_ref[...] * s2_ref[...] + t2_ref[...], 0.0)
    h3p = jnp.dot(h2.astype(w3_ref.dtype), w3_ref[...],
                  preferred_element_type=jnp.float32)
    h3p_ref[...] = h3p
    _accumulate_stats(stats_ref, h3p)      # BN3 statistics


def output_kernel(h3p_ref, scp_ref, s3_ref, t3_ref, ssc_ref, tsc_ref, o_ref):
    # Folded BN3 / BNsc, residual add, final ReLU.  Pure elementwise, parallel.
    h3 = h3p_ref[...] * s3_ref[...] + t3_ref[...]
    sc = scp_ref[...] * ssc_ref[...] + tsc_ref[...]
    o_ref[...] = jnp.maximum(h3 + sc, 0.0)


# ---------------------------------------------------------------------------
# host-side wrapper
# ---------------------------------------------------------------------------

def _pad_cols(w, rows, cols):
    out = jnp.zeros((rows, cols), jnp.float32)
    return out.at[:w.shape[0], :w.shape[1]].set(w.astype(jnp.float32))


def _pad_vec(v, width):
    return jnp.zeros((width,), jnp.float32).at[:v.shape[0]].set(v.astype(jnp.float32))


def _fold_bn(stats, gamma, beta, count):
    """Fold training-mode BN (batch stats over N*L, biased var) into scale/shift."""
    mean = stats[0] / count
    var = stats[1] / count - mean * mean
    scale = gamma * jax.lax.rsqrt(var + EPS)
    shift = beta - mean * scale
    return scale.reshape(1, -1), shift.reshape(1, -1)


def _cost(flops, nbytes):
    return pl.CostEstimate(flops=int(flops), transcendentals=0,
                           bytes_accessed=int(nbytes))


def bottleneck_forward(x_ncl, p, *, samples_per_tile=None,
                       matmul_dtype=jnp.bfloat16):
    """x_ncl: (N, Cin, L) float32 (PyTorch NCL). Returns (N, 4*planes, L)."""
    N, Cin, L = x_ncl.shape
    planes = p["W1"].shape[0]
    Cout = p["W3"].shape[0]
    Cin_pad = _round_up(Cin, LANE)
    P_pad = _round_up(planes, LANE)
    C4_pad = _round_up(Cout, LANE)
    M = N * L
    mm_size = jnp.finfo(matmul_dtype).bits // 8

    # ---- token tiling: whole samples per tile so the k=3 halo stays in-tile.
    if samples_per_tile is None:
        samples_per_tile = max(1, min(N, max(1, 1024 // L)))   # ~<=1K tokens / tile
    if N % samples_per_tile != 0 or (samples_per_tile * L) % 8 != 0:
        samples_per_tile = N                                   # single full-array tile
    tok = samples_per_tile * L
    num_tiles = N // samples_per_tile

    # ---- host-side layout glue: NCL -> token-major (N*L, Cin_pad), lane-padded
    x_tok = jnp.zeros((M, Cin_pad), matmul_dtype).at[:, :Cin].set(
        jnp.transpose(x_ncl, (0, 2, 1)).reshape(M, Cin).astype(matmul_dtype))

    # ---- fused / zero-padded weights (padded channels stay exactly zero
    #      through BN because gamma/beta are zero-padded too)
    w1t = p["W1"][:, :, 0].T                                   # (Cin, planes)
    wsct = p["Wsc"][:, :, 0].T                                 # (Cin, Cout)
    w_a = jnp.concatenate([_pad_cols(w1t, Cin_pad, P_pad),
                           _pad_cols(wsct, Cin_pad, C4_pad)],
                          axis=1).astype(matmul_dtype)         # (Cin_pad, P+4P)
    w2_stack = jnp.concatenate(
        [_pad_cols(p["W2"][:, :, k].T, P_pad, P_pad) for k in range(3)],
        axis=0).astype(matmul_dtype)                           # taps [l-1, l, l+1]
    w3t = _pad_cols(p["W3"][:, :, 0].T, P_pad, C4_pad).astype(matmul_dtype)

    g_a = jnp.concatenate([_pad_vec(p["g1"], P_pad), _pad_vec(p["gsc"], C4_pad)])
    b_a = jnp.concatenate([_pad_vec(p["b1"], P_pad), _pad_vec(p["bsc"], C4_pad)])

    def tiled(width):                       # token-tiled (lane-dense) blocks
        return pl.BlockSpec((tok, width), lambda i: (i, 0))

    def full(shape):                        # resident / broadcast blocks
        return pl.BlockSpec(shape, lambda i: (0, 0))

    stats_params = pltpu.CompilerParams(
        dimension_semantics=("arbitrary",),   # stats accumulate across tiles
        vmem_limit_bytes=VMEM_LIMIT_BYTES)
    par_params = pltpu.CompilerParams(
        dimension_semantics=("parallel",),    # pure normalize pass -> megacore
        vmem_limit_bytes=VMEM_LIMIT_BYTES)

    # ---- pass 1: fused conv1 + shortcut matmul; accumulate BN1 / BNsc stats
    h1_pre, sc_pre, stats_a = pl.pallas_call(
        partial(stats1_kernel, P_pad),
        grid=(num_tiles,),
        in_specs=[tiled(Cin_pad), full((Cin_pad, P_pad + C4_pad))],
        out_specs=(tiled(P_pad), tiled(C4_pad), full((2, P_pad + C4_pad))),
        out_shape=(jax.ShapeDtypeStruct((M, P_pad), jnp.float32),
                   jax.ShapeDtypeStruct((M, C4_pad), jnp.float32),
                   jax.ShapeDtypeStruct((2, P_pad + C4_pad), jnp.float32)),
        compiler_params=stats_params,
        cost_estimate=_cost(2 * M * Cin_pad * (P_pad + C4_pad),
                            (M * Cin_pad + Cin_pad * (P_pad + C4_pad)) * mm_size
                            + 4 * M * (P_pad + C4_pad)),
    )(x_tok, w_a)

    s_a, t_a = _fold_bn(stats_a, g_a, b_a, M)
    s1, t1 = s_a[:, :P_pad], t_a[:, :P_pad]
    ssc, tsc = s_a[:, P_pad:], t_a[:, P_pad:]

    # ---- pass 2: BN1+ReLU, fused 3-tap conv2 matmul; accumulate BN2 stats
    h2_pre, stats2 = pl.pallas_call(
        partial(stats2_kernel, L),
        grid=(num_tiles,),
        in_specs=[tiled(P_pad), full((1, P_pad)), full((1, P_pad)),
                  full((3 * P_pad, P_pad))],
        out_specs=(tiled(P_pad), full((2, P_pad))),
        out_shape=(jax.ShapeDtypeStruct((M, P_pad), jnp.float32),
                   jax.ShapeDtypeStruct((2, P_pad), jnp.float32)),
        compiler_params=stats_params,
        cost_estimate=_cost(2 * M * 3 * P_pad * P_pad,
                            8 * M * P_pad + 3 * P_pad * P_pad * mm_size),
    )(h1_pre, s1, t1, w2_stack)

    s2, t2 = _fold_bn(stats2, _pad_vec(p["g2"], P_pad), _pad_vec(p["b2"], P_pad), M)

    # ---- pass 3: BN2+ReLU, conv3 matmul; accumulate BN3 stats
    h3_pre, stats3 = pl.pallas_call(
        stats3_kernel,
        grid=(num_tiles,),
        in_specs=[tiled(P_pad), full((1, P_pad)), full((1, P_pad)),
                  full((P_pad, C4_pad))],
        out_specs=(tiled(C4_pad), full((2, C4_pad))),
        out_shape=(jax.ShapeDtypeStruct((M, C4_pad), jnp.float32),
                   jax.ShapeDtypeStruct((2, C4_pad), jnp.float32)),
        compiler_params=stats_params,
        cost_estimate=_cost(2 * M * P_pad * C4_pad,
                            4 * M * (P_pad + C4_pad) + P_pad * C4_pad * mm_size),
    )(h2_pre, s2, t2, w3t)

    s3, t3 = _fold_bn(stats3, _pad_vec(p["g3"], C4_pad), _pad_vec(p["b3"], C4_pad), M)

    # ---- pass 4: BN3 / BNsc normalize, residual add, final ReLU
    out_pad = pl.pallas_call(
        output_kernel,
        grid=(num_tiles,),
        in_specs=[tiled(C4_pad), tiled(C4_pad),
                  full((1, C4_pad)), full((1, C4_pad)),
                  full((1, C4_pad)), full((1, C4_pad))],
        out_specs=tiled(C4_pad),
        out_shape=jax.ShapeDtypeStruct((M, C4_pad), jnp.float32),
        compiler_params=par_params,
        cost_estimate=_cost(5 * M * C4_pad, 12 * M * C4_pad),
    )(h3_pre, sc_pre, s3, t3, ssc, tsc)

    # drop channel padding, back to NCL
    return jnp.transpose(out_pad[:, :Cout].reshape(N, L, Cout), (0, 2, 1))


# ---------------------------------------------------------------------------
# pure-JAX reference (PyTorch module semantics, training-mode BN)
# ---------------------------------------------------------------------------

def reference_forward(x, p):
    def conv1d(h, w, pad=0):
        return jax.lax.conv_general_dilated(
            h, w, (1,), [(pad, pad)], dimension_numbers=("NCH", "OIH", "NCH"))

    def bn(h, g, b):
        mean = h.mean(axis=(0, 2), keepdims=True)
        var = ((h - mean) ** 2).mean(axis=(0, 2), keepdims=True)
        return (h - mean) / jnp.sqrt(var + EPS) * g[None, :, None] + b[None, :, None]

    out = jax.nn.relu(bn(conv1d(x, p["W1"]), p["g1"], p["b1"]))
    out = jax.nn.relu(bn(conv1d(out, p["W2"], pad=1), p["g2"], p["b2"]))
    out = bn(conv1d(out, p["W3"]), p["g3"], p["b3"])
    out = out + bn(conv1d(x, p["Wsc"]), p["gsc"], p["bsc"])
    return jax.nn.relu(out)


if __name__ == "__main__":
    key = jax.random.PRNGKey(0)
    N, Cin, L = 2, 4, 16          # batch, in_planes, sequence length
    planes = 4
    Cout = 4 * planes             # expansion = 4

    ks = jax.random.split(key, 13)
    x = jax.random.normal(ks[0], (N, Cin, L), jnp.float32)

    params = {
        "W1":  0.5 * jax.random.normal(ks[1], (planes, Cin, 1), jnp.float32),
        "W2":  0.3 * jax.random.normal(ks[2], (planes, planes, 3), jnp.float32),
        "W3":  0.5 * jax.random.normal(ks[3], (Cout, planes, 1), jnp.float32),
        "Wsc": 0.5 * jax.random.normal(ks[4], (Cout, Cin, 1), jnp.float32),
        "g1": 1.0 + 0.1 * jax.random.normal(ks[5], (planes,), jnp.float32),
        "b1": 0.1 * jax.random.normal(ks[6], (planes,), jnp.float32),
        "g2": 1.0 + 0.1 * jax.random.normal(ks[7], (planes,), jnp.float32),
        "b2": 0.1 * jax.random.normal(ks[8], (planes,), jnp.float32),
        "g3": 1.0 + 0.1 * jax.random.normal(ks[9], (Cout,), jnp.float32),
        "b3": 0.1 * jax.random.normal(ks[10], (Cout,), jnp.float32),
        "gsc": 1.0 + 0.1 * jax.random.normal(ks[11], (Cout,), jnp.float32),
        "bsc": 0.1 * jax.random.normal(ks[12], (Cout,), jnp.float32),
    }

    fwd = jax.jit(bottleneck_forward,
                  static_argnames=("samples_per_tile", "matmul_dtype"))

    # 1) exact float32 matmul path, one sample per tile (exercises the
    #    cross-tile BN statistics accumulation): strict check vs reference.
    out_f32 = jax.block_until_ready(
        fwd(x, params, samples_per_tile=1, matmul_dtype=jnp.float32))
    ref = reference_forward(x, params)
    assert out_f32.shape == (N, Cout, L), out_f32.shape
    assert jnp.allclose(out_f32, ref, atol=1e-3, rtol=1e-3), \
        float(jnp.abs(out_f32 - ref).max())

    # 2) bf16-MXU path (perf review: v6e/v7x). BN/normalization stays f32; the
    #    f32 path above is the exact-semantics check, so this is a sanity check
    #    of the mixed-precision path against the reference evaluated on
    #    bf16-rounded inputs/weights, with a mixed-precision tolerance.
    out_bf16 = jax.block_until_ready(
        fwd(x, params, samples_per_tile=1, matmul_dtype=jnp.bfloat16))
    xq = x.astype(jnp.bfloat16).astype(jnp.float32)
    pq = {k: (v.astype(jnp.bfloat16).astype(jnp.float32) if k.startswith("W") else v)
          for k, v in params.items()}
    ref_q = reference_forward(xq, pq)
    assert out_bf16.shape == (N, Cout, L), out_bf16.shape
    assert jnp.allclose(out_bf16, ref_q, atol=1e-1, rtol=1e-1), \
        float(jnp.abs(out_bf16 - ref_q).max())

    print("KERNEL_OK")
</pallas_src>

<mosaic_0001>
module attributes {stable_mosaic.version = 11 : i64} {
  func.func @stats1_kernel(%arg0: i32, %arg1: memref<16x128xf32, #tpu.memory_space<vmem>>, %arg2: memref<128x256xf32, #tpu.memory_space<vmem>>, %arg3: memref<16x128xf32, #tpu.memory_space<vmem>>, %arg4: memref<16x128xf32, #tpu.memory_space<vmem>>, %arg5: memref<2x256xf32, #tpu.memory_space<vmem>>) attributes {dimension_semantics = [#tpu.dimension_semantics<arbitrary>], iteration_bounds = array<i64: 2>, scalar_prefetch = 0 : i64, scratch_operands = 0 : i64, tpu.core_type = #tpu.core_type<tc>, window_params = [{transform_indices = @transform_0, window_bounds = array<i64: 16, 128>}, {pipeline_mode = #tpu.pipeline_mode<synchronous>, transform_indices = @transform_1, window_bounds = array<i64: 128, 256>}, {transform_indices = @transform_2, window_bounds = array<i64: 16, 128>}, {transform_indices = @transform_3, window_bounds = array<i64: 16, 128>}, {pipeline_mode = #tpu.pipeline_mode<synchronous>, transform_indices = @transform_4, window_bounds = array<i64: 2, 256>}]} {
    %c0 = arith.constant 0 : index
    %c0_0 = arith.constant 0 : index
    %0 = vector.load %arg1[%c0, %c0_0] : memref<16x128xf32, #tpu.memory_space<vmem>>, vector<16x128xf32>
    %c0_1 = arith.constant 0 : index
    %c0_2 = arith.constant 0 : index
    %1 = vector.load %arg2[%c0_1, %c0_2] : memref<128x256xf32, #tpu.memory_space<vmem>>, vector<128x256xf32>
    %cst = arith.constant dense<0.000000e+00> : vector<16x256xf32>
    %2 = tpu.matmul %0, %1, %cst {dimension_numbers = #tpu.dot_dimension_numbers<[1], [0], [0], [1], [0, 0, 1, 1], [], []>} : vector<16x128xf32>, vector<128x256xf32>, vector<16x256xf32> -> vector<16x256xf32>
    %3 = vector.extract_strided_slice %2 {offsets = [0, 0], sizes = [16, 128], strides = [1, 1]} : vector<16x256xf32> to vector<16x128xf32>
    %c0_3 = arith.constant 0 : index
    %c0_4 = arith.constant 0 : index
    %4 = vector.load %arg3[%c0_3, %c0_4] : memref<16x128xf32, #tpu.memory_space<vmem>>, vector<16x128xf32>
    tpu.vector_store %arg3[%c0_3, %c0_4], %3 {strides = array<i32>} : memref<16x128xf32, #tpu.memory_space<vmem>>, vector<16x128xf32>,
    %5 = vector.extract_strided_slice %2 {offsets = [0, 128], sizes = [16, 128], strides = [1, 1]} : vector<16x256xf32> to vector<16x128xf32>
    %c0_5 = arith.constant 0 : index
    %c0_6 = arith.constant 0 : index
    %6 = vector.load %arg4[%c0_5, %c0_6] : memref<16x128xf32, #tpu.memory_space<vmem>>, vector<16x128xf32>
    tpu.vector_store %arg4[%c0_5, %c0_6], %5 {strides = array<i32>} : memref<16x128xf32, #tpu.memory_space<vmem>>, vector<16x128xf32>,
    %c0_i32 = arith.constant 0 : i32
    %7 = arith.cmpi eq, %arg0, %c0_i32 : i32
    %8 = arith.extui %7 : i1 to i32
    %c0_i32_7 = arith.constant 0 : i32
    %9 = arith.cmpi ne, %8, %c0_i32_7 : i32
    scf.if %9 {
      %cst_14 = arith.constant 0.000000e+00 : f32
      %19 = vector.broadcast %cst_14 : f32 to vector<2x256xf32>
      %c0_15 = arith.constant 0 : index
      %c0_16 = arith.constant 0 : index
      %20 = vector.load %arg5[%c0_15, %c0_16] : memref<2x256xf32, #tpu.memory_space<vmem>>, vector<2x256xf32>
      tpu.vector_store %arg5[%c0_15, %c0_16], %19 {strides = array<i32>} : memref<2x256xf32, #tpu.memory_space<vmem>>, vector<2x256xf32>,
    } else {
    }
    %c0_8 = arith.constant 0 : index
    %c0_9 = arith.constant 0 : index
    %10 = vector.load %arg5[%c0_8, %c0_9] : memref<2x256xf32, #tpu.memory_space<vmem>>, vector<2x256xf32>
    %cst_10 = arith.constant dense<0.000000e+00> : vector<256xf32>
    %11 = vector.multi_reduction <add>, %2, %cst_10 [0] : vector<16x256xf32> to vector<256xf32>
    %12 = vector.shape_cast %11 : vector<256xf32> to vector<1x256xf32>
    %13 = arith.mulf %2, %2 : vector<16x256xf32>
    %cst_11 = arith.constant dense<0.000000e+00> : vector<256xf32>
    %14 = vector.multi_reduction <add>, %13, %cst_11 [0] : vector<16x256xf32> to vector<256xf32>
    %15 = vector.shape_cast %14 : vector<256xf32> to vector<1x256xf32>
    %16 = tpu.concatenate %12, %15 in 0 : vector<1x256xf32>, vector<1x256xf32> -> vector<2x256xf32>
    %17 = arith.addf %10, %16 : vector<2x256xf32>
    %c0_12 = arith.constant 0 : index
    %c0_13 = arith.constant 0 : index
    %18 = vector.load %arg5[%c0_12, %c0_13] : memref<2x256xf32, #tpu.memory_space<vmem>>, vector<2x256xf32>
    tpu.vector_store %arg5[%c0_12, %c0_13], %17 {strides = array<i32>} : memref<2x256xf32, #tpu.memory_space<vmem>>, vector<2x256xf32>,
    return
  }
  func.func @transform_0(%arg0: i32) -> (i32, i32) {
    %c0_i32 = arith.constant 0 : i32
    %c0_i32_0 = arith.constant 0 : i32
    return %arg0, %c0_i32 : i32, i32
  }
  func.func @transform_1(%arg0: i32) -> (i32, i32) {
    %c0_i32 = arith.constant 0 : i32
    %c0_i32_0 = arith.constant 0 : i32
    %c0_i32_1 = arith.constant 0 : i32
    return %c0_i32, %c0_i32_0 : i32, i32
  }
  func.func @transform_2(%arg0: i32) -> (i32, i32) {
    %c0_i32 = arith.constant 0 : i32
    %c0_i32_0 = arith.constant 0 : i32
    return %arg0, %c0_i32 : i32, i32
  }
  func.func @transform_3(%arg0: i32) -> (i32, i32) {
    %c0_i32 = arith.constant 0 : i32
    %c0_i32_0 = arith.constant 0 : i32
    return %arg0, %c0_i32 : i32, i32
  }
  func.func @transform_4(%arg0: i32) -> (i32, i32) {
    %c0_i32 = arith.constant 0 : i32
    %c0_i32_0 = arith.constant 0 : i32
    %c0_i32_1 = arith.constant 0 : i32
    return %c0_i32, %c0_i32_0 : i32, i32
  }
}

module attributes {stable_mosaic.version = 11 : i64} {
  func.func @stats2_kernel(%arg0: i32, %arg1: memref<16x128xf32, #tpu.memory_space<vmem>>, %arg2: memref<1x128xf32, #tpu.memory_space<vmem>>, %arg3: memref<1x128xf32, #tpu.memory_space<vmem>>, %arg4: memref<384x128xf32, #tpu.memory_space<vmem>>, %arg5: memref<16x128xf32, #tpu.memory_space<vmem>>, %arg6: memref<2x128xf32, #tpu.memory_space<vmem>>) attributes {dimension_semantics = [#tpu.dimension_semantics<arbitrary>], iteration_bounds = array<i64: 2>, scalar_prefetch = 0 : i64, scratch_operands = 0 : i64, tpu.core_type = #tpu.core_type<tc>, window_params = [{transform_indices = @transform_0, window_bounds = array<i64: 16, 128>}, {pipeline_mode = #tpu.pipeline_mode<synchronous>, transform_indices = @transform_1, window_bounds = array<i64: 1, 128>}, {pipeline_mode = #tpu.pipeline_mode<synchronous>, transform_indices = @transform_2, window_bounds = array<i64: 1, 128>}, {pipeline_mode = #tpu.pipeline_mode<synchronous>, transform_indices = @transform_3, window_bounds = array<i64: 384, 128>}, {transform_indices = @transform_4, window_bounds = array<i64: 16, 128>}, {pipeline_mode = #tpu.pipeline_mode<synchronous>, transform_indices = @transform_5, window_bounds = array<i64: 2, 128>}]} {
    %c0 = arith.constant 0 : index
    %c0_0 = arith.constant 0 : index
    %0 = vector.load %arg1[%c0, %c0_0] : memref<16x128xf32, #tpu.memory_space<vmem>>, vector<16x128xf32>
    %c0_1 = arith.constant 0 : index
    %c0_2 = arith.constant 0 : index
    %1 = vector.load %arg2[%c0_1, %c0_2] : memref<1x128xf32, #tpu.memory_space<vmem>>, vector<1x128xf32>
    %2 = vector.broadcast %1 : vector<1x128xf32> to vector<16x128xf32>
    %3 = arith.mulf %0, %2 : vector<16x128xf32>
    %c0_3 = arith.constant 0 : index
    %c0_4 = arith.constant 0 : index
    %4 = vector.load %arg3[%c0_3, %c0_4] : memref<1x128xf32, #tpu.memory_space<vmem>>, vector<1x128xf32>
    %5 = vector.broadcast %4 : vector<1x128xf32> to vector<16x128xf32>
    %6 = arith.addf %3, %5 : vector<16x128xf32>
    %cst = arith.constant 0.000000e+00 : f32
    %7 = vector.broadcast %cst : f32 to vector<16x128xf32>
    %8 = arith.maximumf %6, %7 : vector<16x128xf32>
    %9 = tpu.iota {dimensions = array<i32: 0>} : vector<16x1xi32>
    %c16_i32 = arith.constant 16 : i32
    %c0_i32 = arith.constant 0 : i32
    %10 = arith.cmpi eq, %c16_i32, %c0_i32 : i32
    %c1_i32 = arith.constant 1 : i32
    %11 = arith.select %10, %c1_i32, %c16_i32 : i32
    %12 = vector.broadcast %11 : i32 to vector<16x1xi32>
    %13 = arith.remsi %9, %12 : vector<16x1xi32>
    %c0_i32_5 = arith.constant 0 : i32
    %14 = vector.broadcast %c0_i32_5 : i32 to vector<16x1xi32>
    %15 = arith.cmpi ne, %13, %14 : vector<16x1xi32>
    %c0_i32_6 = arith.constant 0 : i32
    %16 = vector.broadcast %c0_i32_6 : i32 to vector<16x1xi32>
    %17 = arith.cmpi slt, %13, %16 : vector<16x1xi32>
    %c0_i32_7 = arith.constant 0 : i32
    %18 = arith.cmpi slt, %11, %c0_i32_7 : i32
    %19 = vector.broadcast %18 : i1 to vector<16x1xi1>
    %20 = vector.broadcast %19 : vector<16x1xi1> to vector<16x1xi1>
    %21 = arith.xori %17, %20 : vector<16x1xi1>
    %22 = arith.andi %21, %15 : vector<16x1xi1>
    %23 = vector.broadcast %11 : i32 to vector<16x1xi32>
    %24 = arith.addi %13, %23 : vector<16x1xi32>
    %25 = arith.select %22, %24, %13 : vector<16x1xi1>, vector<16x1xi32>
    %c0_i32_8 = arith.constant 0 : i32
    %26 = vector.broadcast %c0_i32_8 : i32 to vector<16x1xi32>
    %27 = arith.cmpi eq, %25, %26 : vector<16x1xi32>
    %c1_i32_9 = arith.constant 1 : i32
    %28 = tpu.dynamic_rotate %8 by %c1_i32_9 dim 0 : vector<16x128xf32>, i32 -> vector<16x128xf32>
    %cst_10 = arith.constant 0.000000e+00 : f32
    %29 = vector.shape_cast %27 : vector<16x1xi1> to vector<16x1xi1>
    %30 = vector.broadcast %29 : vector<16x1xi1> to vector<16x128xi1>
    %31 = vector.broadcast %cst_10 : f32 to vector<16x128xf32>
    %32 = arith.select %30, %31, %28 : vector<16x128xi1>, vector<16x128xf32>
    %c15_i32 = arith.constant 15 : i32
    %33 = vector.broadcast %c15_i32 : i32 to vector<16x1xi32>
    %34 = arith.cmpi eq, %25, %33 : vector<16x1xi32>
    %c15_i32_11 = arith.constant 15 : i32
    %35 = tpu.dynamic_rotate %8 by %c15_i32_11 dim 0 : vector<16x128xf32>, i32 -> vector<16x128xf32>
    %cst_12 = arith.constant 0.000000e+00 : f32
    %36 = vector.shape_cast %34 : vector<16x1xi1> to vector<16x1xi1>
    %37 = vector.broadcast %36 : vector<16x1xi1> to vector<16x128xi1>
    %38 = vector.broadcast %cst_12 : f32 to vector<16x128xf32>
    %39 = arith.select %37, %38, %35 : vector<16x128xi1>, vector<16x128xf32>
    %40 = tpu.concatenate %32, %8, %39 in 1 : vector<16x128xf32>, vector<16x128xf32>, vector<16x128xf32> -> vector<16x384xf32>
    %c0_13 = arith.constant 0 : index
    %c0_14 = arith.constant 0 : index
    %41 = vector.load %arg4[%c0_13, %c0_14] : memref<384x128xf32, #tpu.memory_space<vmem>>, vector<384x128xf32>
    %cst_15 = arith.constant dense<0.000000e+00> : vector<16x128xf32>
    %42 = tpu.matmul %40, %41, %cst_15 {dimension_numbers = #tpu.dot_dimension_numbers<[1], [0], [0], [1], [0, 0, 1, 1], [], []>} : vector<16x384xf32>, vector<384x128xf32>, vector<16x128xf32> -> vector<16x128xf32>
    %c0_16 = arith.constant 0 : index
    %c0_17 = arith.constant 0 : index
    %43 = vector.load %arg5[%c0_16, %c0_17] : memref<16x128xf32, #tpu.memory_space<vmem>>, vector<16x128xf32>
    tpu.vector_store %arg5[%c0_16, %c0_17], %42 {strides = array<i32>} : memref<16x128xf32, #tpu.memory_space<vmem>>, vector<16x128xf32>,
    %c0_i32_18 = arith.constant 0 : i32
    %44 = arith.cmpi eq, %arg0, %c0_i32_18 : i32
    %45 = arith.extui %44 : i1 to i32
    %c0_i32_19 = arith.constant 0 : i32
    %46 = arith.cmpi ne, %45, %c0_i32_19 : i32
    scf.if %46 {
      %cst_26 = arith.constant 0.000000e+00 : f32
      %56 = vector.broadcast %cst_26 : f32 to vector<2x128xf32>
      %c0_27 = arith.constant 0 : index
      %c0_28 = arith.constant 0 : index
      %57 = vector.load %arg6[%c0_27, %c0_28] : memref<2x128xf32, #tpu.memory_space<vmem>>, vector<2x128xf32>
      tpu.vector_store %arg6[%c0_27, %c0_28], %56 {strides = array<i32>} : memref<2x128xf32, #tpu.memory_space<vmem>>, vector<2x128xf32>,
    } else {
    }
    %c0_20 = arith.constant 0 : index
    %c0_21 = arith.constant 0 : index
    %47 = vector.load %arg6[%c0_20, %c0_21] : memref<2x128xf32, #tpu.memory_space<vmem>>, vector<2x128xf32>
    %cst_22 = arith.constant dense<0.000000e+00> : vector<128xf32>
    %48 = vector.multi_reduction <add>, %42, %cst_22 [0] : vector<16x128xf32> to vector<128xf32>
    %49 = vector.shape_cast %48 : vector<128xf32> to vector<1x128xf32>
    %50 = arith.mulf %42, %42 : vector<16x128xf32>
    %cst_23 = arith.constant dense<0.000000e+00> : vector<128xf32>
    %51 = vector.multi_reduction <add>, %50, %cst_23 [0] : vector<16x128xf32> to vector<128xf32>
    %52 = vector.shape_cast %51 : vector<128xf32> to vector<1x128xf32>
    %53 = tpu.concatenate %49, %52 in 0 : vector<1x128xf32>, vector<1x128xf32> -> vector<2x128xf32>
    %54 = arith.addf %47, %53 : vector<2x128xf32>
    %c0_24 = arith.constant 0 : index
    %c0_25 = arith.constant 0 : index
    %55 = vector.load %arg6[%c0_24, %c0_25] : memref<2x128xf32, #tpu.memory_space<vmem>>, vector<2x128xf32>
    tpu.vector_store %arg6[%c0_24, %c0_25], %54 {strides = array<i32>} : memref<2x128xf32, #tpu.memory_space<vmem>>, vector<2x128xf32>,
    return
  }
  func.func @transform_0(%arg0: i32) -> (i32, i32) {
    %c0_i32 = arith.constant 0 : i32
    %c0_i32_0 = arith.constant 0 : i32
    return %arg0, %c0_i32 : i32, i32
  }
  func.func @transform_1(%arg0: i32) -> (i32, i32) {
    %c0_i32 = arith.constant 0 : i32
    %c0_i32_0 = arith.constant 0 : i32
    %c0_i32_1 = arith.constant 0 : i32
    return %c0_i32, %c0_i32_0 : i32, i32
  }
  func.func @transform_2(%arg0: i32) -> (i32, i32) {
    %c0_i32 = arith.constant 0 : i32
    %c0_i32_0 = arith.constant 0 : i32
    %c0_i32_1 = arith.constant 0 : i32
    return %c0_i32, %c0_i32_0 : i32, i32
  }
  func.func @transform_3(%arg0: i32) -> (i32, i32) {
    %c0_i32 = arith.constant 0 : i32
    %c0_i32_0 = arith.constant 0 : i32
    %c0_i32_1 = arith.constant 0 : i32
    return %c0_i32, %c0_i32_0 : i32, i32
  }
  func.func @transform_4(%arg0: i32) -> (i32, i32) {
    %c0_i32 = arith.constant 0 : i32
    %c0_i32_0 = arith.constant 0 : i32
    return %arg0, %c0_i32 : i32, i32
  }
  func.func @transform_5(%arg0: i32) -> (i32, i32) {
    %c0_i32 = arith.constant 0 : i32
    %c0_i32_0 = arith.constant 0 : i32
    %c0_i32_1 = arith.constant 0 : i32
    return %c0_i32, %c0_i32_0 : i32, i32
  }
}

module attributes {stable_mosaic.version = 11 : i64} {
  func.func @stats3_kernel(%arg0: i32, %arg1: memref<16x128xf32, #tpu.memory_space<vmem>>, %arg2: memref<1x128xf32, #tpu.memory_space<vmem>>, %arg3: memref<1x128xf32, #tpu.memory_space<vmem>>, %arg4: memref<128x128xf32, #tpu.memory_space<vmem>>, %arg5: memref<16x128xf32, #tpu.memory_space<vmem>>, %arg6: memref<2x128xf32, #tpu.memory_space<vmem>>) attributes {dimension_semantics = [#tpu.dimension_semantics<arbitrary>], iteration_bounds = array<i64: 2>, scalar_prefetch = 0 : i64, scratch_operands = 0 : i64, tpu.core_type = #tpu.core_type<tc>, window_params = [{transform_indices = @transform_0, window_bounds = array<i64: 16, 128>}, {pipeline_mode = #tpu.pipeline_mode<synchronous>, transform_indices = @transform_1, window_bounds = array<i64: 1, 128>}, {pipeline_mode = #tpu.pipeline_mode<synchronous>, transform_indices = @transform_2, window_bounds = array<i64: 1, 128>}, {pipeline_mode = #tpu.pipeline_mode<synchronous>, transform_indices = @transform_3, window_bounds = array<i64: 128, 128>}, {transform_indices = @transform_4, window_bounds = array<i64: 16, 128>}, {pipeline_mode = #tpu.pipeline_mode<synchronous>, transform_indices = @transform_5, window_bounds = array<i64: 2, 128>}]} {
    %c0 = arith.constant 0 : index
    %c0_0 = arith.constant 0 : index
    %0 = vector.load %arg1[%c0, %c0_0] : memref<16x128xf32, #tpu.memory_space<vmem>>, vector<16x128xf32>
    %c0_1 = arith.constant 0 : index
    %c0_2 = arith.constant 0 : index
    %1 = vector.load %arg2[%c0_1, %c0_2] : memref<1x128xf32, #tpu.memory_space<vmem>>, vector<1x128xf32>
    %2 = vector.broadcast %1 : vector<1x128xf32> to vector<16x128xf32>
    %3 = arith.mulf %0, %2 : vector<16x128xf32>
    %c0_3 = arith.constant 0 : index
    %c0_4 = arith.constant 0 : index
    %4 = vector.load %arg3[%c0_3, %c0_4] : memref<1x128xf32, #tpu.memory_space<vmem>>, vector<1x128xf32>
    %5 = vector.broadcast %4 : vector<1x128xf32> to vector<16x128xf32>
    %6 = arith.addf %3, %5 : vector<16x128xf32>
    %cst = arith.constant 0.000000e+00 : f32
    %7 = vector.broadcast %cst : f32 to vector<16x128xf32>
    %8 = arith.maximumf %6, %7 : vector<16x128xf32>
    %c0_5 = arith.constant 0 : index
    %c0_6 = arith.constant 0 : index
    %9 = vector.load %arg4[%c0_5, %c0_6] : memref<128x128xf32, #tpu.memory_space<vmem>>, vector<128x128xf32>
    %cst_7 = arith.constant dense<0.000000e+00> : vector<16x128xf32>
    %10 = tpu.matmul %8, %9, %cst_7 {dimension_numbers = #tpu.dot_dimension_numbers<[1], [0], [0], [1], [0, 0, 1, 1], [], []>} : vector<16x128xf32>, vector<128x128xf32>, vector<16x128xf32> -> vector<16x128xf32>
    %c0_8 = arith.constant 0 : index
    %c0_9 = arith.constant 0 : index
    %11 = vector.load %arg5[%c0_8, %c0_9] : memref<16x128xf32, #tpu.memory_space<vmem>>, vector<16x128xf32>
    tpu.vector_store %arg5[%c0_8, %c0_9], %10 {strides = array<i32>} : memref<16x128xf32, #tpu.memory_space<vmem>>, vector<16x128xf32>,
    %c0_i32 = arith.constant 0 : i32
    %12 = arith.cmpi eq, %arg0, %c0_i32 : i32
    %13 = arith.extui %12 : i1 to i32
    %c0_i32_10 = arith.constant 0 : i32
    %14 = arith.cmpi ne, %13, %c0_i32_10 : i32
    scf.if %14 {
      %cst_17 = arith.constant 0.000000e+00 : f32
      %24 = vector.broadcast %cst_17 : f32 to vector<2x128xf32>
      %c0_18 = arith.constant 0 : index
      %c0_19 = arith.constant 0 : index
      %25 = vector.load %arg6[%c0_18, %c0_19] : memref<2x128xf32, #tpu.memory_space<vmem>>, vector<2x128xf32>
      tpu.vector_store %arg6[%c0_18, %c0_19], %24 {strides = array<i32>} : memref<2x128xf32, #tpu.memory_space<vmem>>, vector<2x128xf32>,
    } else {
    }
    %c0_11 = arith.constant 0 : index
    %c0_12 = arith.constant 0 : index
    %15 = vector.load %arg6[%c0_11, %c0_12] : memref<2x128xf32, #tpu.memory_space<vmem>>, vector<2x128xf32>
    %cst_13 = arith.constant dense<0.000000e+00> : vector<128xf32>
    %16 = vector.multi_reduction <add>, %10, %cst_13 [0] : vector<16x128xf32> to vector<128xf32>
    %17 = vector.shape_cast %16 : vector<128xf32> to vector<1x128xf32>
    %18 = arith.mulf %10, %10 : vector<16x128xf32>
    %cst_14 = arith.constant dense<0.000000e+00> : vector<128xf32>
    %19 = vector.multi_reduction <add>, %18, %cst_14 [0] : vector<16x128xf32> to vector<128xf32>
    %20 = vector.shape_cast %19 : vector<128xf32> to vector<1x128xf32>
    %21 = tpu.concatenate %17, %20 in 0 : vector<1x128xf32>, vector<1x128xf32> -> vector<2x128xf32>
    %22 = arith.addf %15, %21 : vector<2x128xf32>
    %c0_15 = arith.constant 0 : index
    %c0_16 = arith.constant 0 : index
    %23 = vector.load %arg6[%c0_15, %c0_16] : memref<2x128xf32, #tpu.memory_space<vmem>>, vector<2x128xf32>
    tpu.vector_store %arg6[%c0_15, %c0_16], %22 {strides = array<i32>} : memref<2x128xf32, #tpu.memory_space<vmem>>, vector<2x128xf32>,
    return
  }
  func.func @transform_0(%arg0: i32) -> (i32, i32) {
    %c0_i32 = arith.constant 0 : i32
    %c0_i32_0 = arith.constant 0 : i32
    return %arg0, %c0_i32 : i32, i32
  }
  func.func @transform_1(%arg0: i32) -> (i32, i32) {
    %c0_i32 = arith.constant 0 : i32
    %c0_i32_0 = arith.constant 0 : i32
    %c0_i32_1 = arith.constant 0 : i32
    return %c0_i32, %c0_i32_0 : i32, i32
  }
  func.func @transform_2(%arg0: i32) -> (i32, i32) {
    %c0_i32 = arith.constant 0 : i32
    %c0_i32_0 = arith.constant 0 : i32
    %c0_i32_1 = arith.constant 0 : i32
    return %c0_i32, %c0_i32_0 : i32, i32
  }
  func.func @transform_3(%arg0: i32) -> (i32, i32) {
    %c0_i32 = arith.constant 0 : i32
    %c0_i32_0 = arith.constant 0 : i32
    %c0_i32_1 = arith.constant 0 : i32
    return %c0_i32, %c0_i32_0 : i32, i32
  }
  func.func @transform_4(%arg0: i32) -> (i32, i32) {
    %c0_i32 = arith.constant 0 : i32
    %c0_i32_0 = arith.constant 0 : i32
    return %arg0, %c0_i32 : i32, i32
  }
  func.func @transform_5(%arg0: i32) -> (i32, i32) {
    %c0_i32 = arith.constant 0 : i32
    %c0_i32_0 = arith.constant 0 : i32
    %c0_i32_1 = arith.constant 0 : i32
    return %c0_i32, %c0_i32_0 : i32, i32
  }
}

module attributes {stable_mosaic.version = 11 : i64} {
  func.func @output_kernel(%arg0: i32, %arg1: memref<16x128xf32, #tpu.memory_space<vmem>>, %arg2: memref<16x128xf32, #tpu.memory_space<vmem>>, %arg3: memref<1x128xf32, #tpu.memory_space<vmem>>, %arg4: memref<1x128xf32, #tpu.memory_space<vmem>>, %arg5: memref<1x128xf32, #tpu.memory_space<vmem>>, %arg6: memref<1x128xf32, #tpu.memory_space<vmem>>, %arg7: memref<16x128xf32, #tpu.memory_space<vmem>>) attributes {dimension_semantics = [#tpu.dimension_semantics<parallel>], iteration_bounds = array<i64: 2>, scalar_prefetch = 0 : i64, scratch_operands = 0 : i64, tpu.core_type = #tpu.core_type<tc>, window_params = [{transform_indices = @transform_0, window_bounds = array<i64: 16, 128>}, {transform_indices = @transform_1, window_bounds = array<i64: 16, 128>}, {pipeline_mode = #tpu.pipeline_mode<synchronous>, transform_indices = @transform_2, window_bounds = array<i64: 1, 128>}, {pipeline_mode = #tpu.pipeline_mode<synchronous>, transform_indices = @transform_3, window_bounds = array<i64: 1, 128>}, {pipeline_mode = #tpu.pipeline_mode<synchronous>, transform_indices = @transform_4, window_bounds = array<i64: 1, 128>}, {pipeline_mode = #tpu.pipeline_mode<synchronous>, transform_indices = @transform_5, window_bounds = array<i64: 1, 128>}, {transform_indices = @transform_6, window_bounds = array<i64: 16, 128>}]} {
    %c0 = arith.constant 0 : index
    %c0_0 = arith.constant 0 : index
    %0 = vector.load %arg1[%c0, %c0_0] : memref<16x128xf32, #tpu.memory_space<vmem>>, vector<16x128xf32>
    %c0_1 = arith.constant 0 : index
    %c0_2 = arith.constant 0 : index
    %1 = vector.load %arg3[%c0_1, %c0_2] : memref<1x128xf32, #tpu.memory_space<vmem>>, vector<1x128xf32>
    %2 = vector.broadcast %1 : vector<1x128xf32> to vector<16x128xf32>
    %3 = arith.mulf %0, %2 : vector<16x128xf32>
    %c0_3 = arith.constant 0 : index
    %c0_4 = arith.constant 0 : index
    %4 = vector.load %arg4[%c0_3, %c0_4] : memref<1x128xf32, #tpu.memory_space<vmem>>, vector<1x128xf32>
    %5 = vector.broadcast %4 : vector<1x128xf32> to vector<16x128xf32>
    %6 = arith.addf %3, %5 : vector<16x128xf32>
    %c0_5 = arith.constant 0 : index
    %c0_6 = arith.constant 0 : index
    %7 = vector.load %arg2[%c0_5, %c0_6] : memref<16x128xf32, #tpu.memory_space<vmem>>, vector<16x128xf32>
    %c0_7 = arith.constant 0 : index
    %c0_8 = arith.constant 0 : index
    %8 = vector.load %arg5[%c0_7, %c0_8] : memref<1x128xf32, #tpu.memory_space<vmem>>, vector<1x128xf32>
    %9 = vector.broadcast %8 : vector<1x128xf32> to vector<16x128xf32>
    %10 = arith.mulf %7, %9 : vector<16x128xf32>
    %c0_9 = arith.constant 0 : index
    %c0_10 = arith.constant 0 : index
    %11 = vector.load %arg6[%c0_9, %c0_10] : memref<1x128xf32, #tpu.memory_space<vmem>>, vector<1x128xf32>
    %12 = vector.broadcast %11 : vector<1x128xf32> to vector<16x128xf32>
    %13 = arith.addf %10, %12 : vector<16x128xf32>
    %14 = arith.addf %6, %13 : vector<16x128xf32>
    %cst = arith.constant 0.000000e+00 : f32
    %15 = vector.broadcast %cst : f32 to vector<16x128xf32>
    %16 = arith.maximumf %14, %15 : vector<16x128xf32>
    %c0_11 = arith.constant 0 : index
    %c0_12 = arith.constant 0 : index
    %17 = vector.load %arg7[%c0_11, %c0_12] : memref<16x128xf32, #tpu.memory_space<vmem>>, vector<16x128xf32>
    tpu.vector_store %arg7[%c0_11, %c0_12], %16 {strides = array<i32>} : memref<16x128xf32, #tpu.memory_space<vmem>>, vector<16x128xf32>,
    return
  }
  func.func @transform_0(%arg0: i32) -> (i32, i32) {
    %c0_i32 = arith.constant 0 : i32
    %c0_i32_0 = arith.constant 0 : i32
    return %arg0, %c0_i32 : i32, i32
  }
  func.func @transform_1(%arg0: i32) -> (i32, i32) {
    %c0_i32 = arith.constant 0 : i32
    %c0_i32_0 = arith.constant 0 : i32
    return %arg0, %c0_i32 : i32, i32
  }
  func.func @transform_2(%arg0: i32) -> (i32, i32) {
    %c0_i32 = arith.constant 0 : i32
    %c0_i32_0 = arith.constant 0 : i32
    %c0_i32_1 = arith.constant 0 : i32
    return %c0_i32, %c0_i32_0 : i32, i32
  }
  func.func @transform_3(%arg0: i32) -> (i32, i32) {
    %c0_i32 = arith.constant 0 : i32
    %c0_i32_0 = arith.constant 0 : i32
    %c0_i32_1 = arith.constant 0 : i32
    return %c0_i32, %c0_i32_0 : i32, i32
  }
  func.func @transform_4(%arg0: i32) -> (i32, i32) {
    %c0_i32 = arith.constant 0 : i32
    %c0_i32_0 = arith.constant 0 : i32
    %c0_i32_1 = arith.constant 0 : i32
    return %c0_i32, %c0_i32_0 : i32, i32
  }
  func.func @transform_5(%arg0: i32) -> (i32, i32) {
    %c0_i32 = arith.constant 0 : i32
    %c0_i32_0 = arith.constant 0 : i32
    %c0_i32_1 = arith.constant 0 : i32
    return %c0_i32, %c0_i32_0 : i32, i32
  }
  func.func @transform_6(%arg0: i32) -> (i32, i32) {
    %c0_i32 = arith.constant 0 : i32
    %c0_i32_0 = arith.constant 0 : i32
    return %arg0, %c0_i32 : i32, i32
  }
}

</mosaic_0001>

<bundles_post_ra>
// kernel: bottleneck_forward.5
= control target key start
LH: loop header
LB: loop body
LE: loop exit
PB: predicated region body
PF: predicated region fallthrough
CT: control target
= control target key end

     0   :  { %11 = vsyncpa [#allocation3], 0  ;;  %s1559_s0 = inlined_call_operand.hbm [shape: f32[32,128], index: 0, kind: input, shape index: {}]   ;;  %s1560_s1 = inlined_call_operand.hbm [shape: f32[1,128], index: 1, kind: input, shape index: {}]   ;;  %s1561_s2 = inlined_call_operand.hbm [shape: f32[1,128], index: 2, kind: input, shape index: {}]   ;;  %s1562_s3 = inlined_call_operand.hbm [shape: f32[384,128], index: 3, kind: input, shape index: {}]   ;;  %s1563_s4 = inlined_call_operand.hbm [shape: f32[32,128], index: 4, kind: output, shape index: {0}]   ;;  %s1564_s5 = inlined_call_operand.hbm [shape: f32[2,128], index: 5, kind: output, shape index: {1}]  }
   0x1   :  { %13 = vsyncpa [#allocation3 + $0x1], 0 }
   0x2   :  { %14 = vsyncpa [#allocation6], 0 }
   0x3   :  { %15 = vsyncpa [#allocation9], 0 }
   0x4   :  { %16 = vsyncpa [#allocation4], 0 }
   0x5   :  { %18 = vsyncpa [#allocation4 + $0x1], 0 }
   0x6   :  { %19 = vsyncpa [#allocation12], 0  ;;  %s1261_s18 = smov 0   ;;  %s1263_s19 = smov 0  }
   0x7   :  { %s1265_s20 = smov 0   ;;  %s1267_s21 = smov 0  }
   0x8 LB: > { %s1282_s22 = sadd.s32 4294967295, %s1218_s21   ;;  %s723_s23 = sadd.s32 4294967294, %s1218_s21   ;;  %s1218_s21 = sphi %s1267_s21, %s1593_s21   ;;  %s1214_s20 = sphi %s1265_s20, %s1592_s20   ;;  %s1210_s19 = sphi %s1263_s19, %s1591_s19   ;;  %s1206_s18 = sphi %s1261_s18, %s1590_s18  }
   0x9   : > { %p45_p0 = scmp.ne.s32.totalorder %s1210_s19, %s1206_s18  ;;  %p1565_p1 = scmp.eq.s32.totalorder %s1282_s22, 0 }
   0xa   : > { %p138_p3 = scmp.eq.s32.totalorder %s723_s23, 1  ;;  %p724_p5 = scmp.ge.s32.totalorder %s1218_s21, 1 }
   0xb   : > { %p1291_p4 = por %p1565_p1, %p45_p0  ;;  %p166_p7 = scmp.lt.s32.totalorder %s1218_s21, 3 }
   0xc   : > { %p1296_p6 = por %p138_p3, %p45_p0  ;;  %s1220_s27 = smov [#allocation5]  }
   0xd   : > { %s1568_s24 = scalar_select %p1291_p4, 1, 0 }
   0xe   : > { %s1569_s25 = scalar_select %p1296_p6, 1, 0 }
   0xf   : > { %p1302_p9 = pnand %p724_p5, %p166_p7  ;;  %s179_s28 = sshll.u32 %s1220_s27, 4  ;;  %s180_s28 = int_to_ptr.vmem [resolvable:$true] %s179_s28 }
  0x10   : > { %s1221_s29 = smov [#allocation7]   ;;  %s1222_s7 = smov [#allocation8]  }
  0x11   : > { %s1570_s26 = scalar_select %p1302_p9, 1, 0 }
  0x12   : > { %p931_p11 = pneg %p1302_p9  ;;  %s190_s30 = sshll.u32 %s1221_s29, 4  ;;  %s1315_s30 = int_to_ptr.vmem [resolvable:$true] %s190_s30 }
  0x13   : > { %s200_s8 = sshll.u32 %s1222_s7, 4  ;;  %s1000_s11 = scalar_lea.hbm %s1560_s1, 16  ;;  %s1317_s8 = int_to_ptr.vmem [resolvable:$true] %s200_s8 }
  0x14   : > { %p1311_p12 = pnand %p931_p11, %p1565_p1  ;;  %p1001_p13 = scmp.ne.s32.totalorder %s1560_s1, %s1000_s11 }
  0x15   : > { %p1007_p7 = scmp.lt.u32.totalorder %s1000_s11, %s1560_s1 }
  0x16   : > { %p1327_p0 = pneg %p1311_p12 }
  0x18   : > { %p1003_p3 = pnand %p1327_p0, %p1001_p13 }
  0x1a   : > { %p1004_p5 = pneg %p1003_p3 }
  0x1c   : > { %p1009_p11 = pnand %p1007_p7, %p1004_p5 }
  0x1e   : > { %1012 = shalt.err (!%p1009_p11)
}
  0x1f   : > { %s1013_s17 = scalar_lea.vmem %s180_s28, 16  ;;  %s1020_s23 = scalar_lea.vmem %s180_s28, 32 }
  0x20   : > { %p1014_p10 = scmp.ne.s32.totalorder %s180_s28, %s1013_s17  ;;  %p1021_p2 = scmp.lt.s32.totalorder %s180_s28, %s180_s28 }
  0x21   : > { %p1022_p6 = scmp.lt.s32.totalorder %s1020_s23, %s1013_s17 }
  0x22   : > { %p1016_p8 = pnand %p1014_p10, %p1327_p0 }
  0x23   : > { %p1023_p4 = por %p1022_p6, %p1021_p2 }
  0x24   : > { %p1017_p1 = pneg %p1016_p8 }
  0x26   : > { %p1024_p9 = pnand %p1023_p4, %p1017_p1 }
  0x28   : > { %1027 = shalt.err (!%p1024_p9)
}
  0x29   : > { %934 = dma.hbm_to_vmem [thread:$0]  (!%p1311_p12), %s1560_s1, 16, %s180_s28, [#allocation6]  }
  0x2a   : > { %s1028_s10 = scalar_lea.hbm %s1561_s2, 16 }
  0x2b   : > { %p1029_p8 = scmp.ne.s32.totalorder %s1561_s2, %s1028_s10  ;;  %p1035_p1 = scmp.lt.u32.totalorder %s1028_s10, %s1561_s2 }
  0x2d   : > { %p1031_p10 = pnand %p1029_p8, %p1327_p0 }
  0x2f   : > { %p1032_p2 = pneg %p1031_p10 }
  0x31   : > { %p1037_p4 = pnand %p1035_p1, %p1032_p2 }
  0x33   : > { %1040 = shalt.err (!%p1037_p4)
}
  0x34   : > { %s1041_s28 = scalar_lea.vmem %s1315_s30, 16  ;;  %s1048_s16 = scalar_lea.vmem %s1315_s30, 32 }
  0x35   : > { %p1042_p6 = scmp.ne.s32.totalorder %s1315_s30, %s1041_s28  ;;  %p1049_p3 = scmp.lt.s32.totalorder %s1315_s30, %s1315_s30 }
  0x36   : > { %p1050_p5 = scmp.lt.s32.totalorder %s1048_s16, %s1041_s28 }
  0x37   : > { %p1044_p9 = pnand %p1042_p6, %p1327_p0 }
  0x38   : > { %p1051_p7 = por %p1050_p5, %p1049_p3 }
  0x39   : > { %p1045_p13 = pneg %p1044_p9 }
  0x3b   : > { %p1052_p11 = pnand %p1051_p7, %p1045_p13 }
  0x3d   : > { %1055 = shalt.err (!%p1052_p11)
}
  0x3e   : > { %937 = dma.hbm_to_vmem [thread:$0]  (!%p1311_p12), %s1561_s2, 16, %s1315_s30, [#allocation6]  }
  0x3f   : > { %s1056_s7 = scalar_lea.hbm %s1562_s3, 6144 }
  0x40   : > { %p1057_p8 = scmp.ne.s32.totalorder %s1562_s3, %s1056_s7  ;;  %p1063_p1 = scmp.lt.u32.totalorder %s1056_s7, %s1562_s3 }
  0x42   : > { %p1059_p10 = pnand %p1057_p8, %p1327_p0 }
  0x44   : > { %p1060_p2 = pneg %p1059_p10 }
  0x46   : > { %p1065_p4 = pnand %p1063_p1, %p1060_p2 }
  0x48   : > { %1068 = shalt.err (!%p1065_p4)
}
  0x49   : > { %s1069_s30 = scalar_lea.vmem %s1317_s8, 6144  ;;  %p1077_p3 = scmp.lt.s32.totalorder %s1317_s8, %s1317_s8 }
  0x4a   : > { %p1070_p6 = scmp.ne.s32.totalorder %s1317_s8, %s1069_s30  ;;  %p1078_p5 = scmp.lt.s32.totalorder %s1069_s30, %s1069_s30 }
  0x4c   : > { %p1072_p9 = pnand %p1070_p6, %p1327_p0  ;;  %p1079_p7 = por %p1078_p5, %p1077_p3 }
  0x4e   : > { %p1073_p13 = pneg %p1072_p9 }
  0x50   : > { %p1080_p11 = pnand %p1079_p7, %p1073_p13 }
  0x52   : > { %1083 = shalt.err (!%p1080_p11)
}
  0x53   : > { %s1223_s13 = smov 128   ;;  %s1224_s14 = smov 8  }
  0x54   : > { %940 = dma.hbm_to_vmem [thread:$0]  (!%p1311_p12), %s1562_s3, 6144, %s1317_s8, [#allocation9], %s1223_s13, %s1223_s13, %s1224_s14  }
  0x55   : > { %s1394_s16 = sadd.s32 1, %s1218_s21   ;;  %s32_s23 = sadd.s32 1, %s1214_s20 }
  0x56   : > { %s29_s17 = ssub.s32 %s1218_s21, %s1394_s16  ;;  %p39_p8 = scmp.ne.s32.totalorder %s1214_s20, %s1210_s19 }
  0x57   : > { %p30_p0 = scmp.eq.s32.totalorder %s29_s17, 0  ;;  %p40_p10 = scmp.eq.s32.totalorder %s1218_s21, 0 }
  0x58   : > { %p952_p2 = scmp.lt.s32.totalorder %s1218_s21, 2  ;;  %p1573_p4 = scmp.eq.s32.totalorder %s1282_s22, 1 }
  0x59   : > { %s1404_s27 = scalar_select %p30_p0, %s1214_s20, %s32_s23  }
  0x5a   : > { %p41_p1 = por %p40_p10, %p39_p8  ;;  %p1408_p6 = por %p1573_p4, %p39_p8 }
  0x5b   : > { %s214_s29 = sand.u32 1, %s1214_s20   ;;  %s752_s7 = sshll.u32 %s1218_s21, 8 }
  0x5c   : > { %s729_s8 = sshll.u32 %s214_s29, 4  ;;  %s1417_s11 = scalar_lea.hbm %s1559_s0, %s752_s7 }
  0x5d   : > { %s218_s12 = scalar_lea.vmem [#allocation2], %s729_s8  ;;  %p1419_p12 = pnand %p952_p2, %p41_p1 }
  0x5e   : > { %s225_s30 = sshll.u32 %s218_s12, 4  ;;  %s1425_s28 = scalar_lea.sflag [#allocation3], %s214_s29  ;;  %s1423_s30 = int_to_ptr.vmem [resolvable:$true] %s225_s30 }
  0x5f   : > { %s1084_s17 = scalar_lea.hbm %s1417_s11, 256  ;;  %p1086_p13 = pneg %p1419_p12 }
  0x60   : > { %p1085_p9 = scmp.ne.s32.totalorder %s1417_s11, %s1084_s17  ;;  %s1089_s8 = scalar_lea.hbm %s1559_s0, 512 }
  0x61   : > { %p1090_p7 = scmp.lt.u32.totalorder %s1417_s11, %s1559_s0  ;;  %p1091_p11 = scmp.lt.u32.totalorder %s1089_s8, %s1084_s17 }
  0x62   : > { %p1087_p3 = pnand %p1086_p13, %p1085_p9  ;;  %p1093_p8 = scmp.lt.u32.totalorder %s1084_s17, %s1417_s11 }
  0x63   : > { %p1092_p0 = por %p1091_p11, %p1090_p7 }
  0x64   : > { %p1088_p5 = pneg %p1087_p3 }
  0x65   : > { %p1094_p10 = por %p1093_p8, %p1092_p0 }
  0x67   : > { %p1095_p2 = pnand %p1094_p10, %p1088_p5 }
  0x69   : > { %1098 = shalt.err (!%p1095_p2)
}
  0x6a   : > { %s1099_s29 = scalar_lea.vmem %s1423_s30, 256  ;;  %s1225_s12 = smov [#allocation2]  }
  0x6b   : > { %p1100_p1 = scmp.ne.s32.totalorder %s1423_s30, %s1099_s29  ;;  %s1104_s23 = sshll.u32 %s1225_s12, 4  ;;  %s1105_s23 = int_to_ptr.vmem [resolvable:$false] %s1104_s23 }
  0x6c   : > { %s1106_s7 = scalar_lea.vmem %s1105_s23, 512  ;;  %p1107_p3 = scmp.lt.s32.totalorder %s1423_s30, %s1105_s23 }
  0x6d   : > { %p1102_p4 = pnand %p1100_p1, %p1086_p13  ;;  %p1108_p7 = scmp.lt.s32.totalorder %s1106_s7, %s1099_s29 }
  0x6f   : > { %p1103_p9 = pneg %p1102_p4  ;;  %p1109_p11 = por %p1108_p7, %p1107_p3 }
  0x71   : > { %p1110_p0 = pnand %p1109_p11, %p1103_p9 }
  0x73   : > { %1113 = shalt.err (!%p1110_p0)
}
  0x74   : > { %944 = dma.hbm_to_vmem [thread:$0]  (!%p1419_p12), %s1417_s11, 256, %s1423_s30, %s1425_s28, %s1223_s13, %s1223_s13, %s1224_s14  }
  0x75   : > { %p1576_p13 = scmp.ne.s32.totalorder %s1570_s26, 0 }
  0x76   : > { %s1459_s17 = sand.u32 (!%p1576_p13), 1, %s1210_s19   ;;  %p1577_p5 = scmp.ne.s32.totalorder (!%p1576_p13), %s1568_s24, 0 }
  0x77   : > { %237 = sbr.rel (%p1576_p13) target bundleno = 445 (0x1bd), region = 36  ;;  %s733_s8 = sshll.u32 (!%p1576_p13), %s1459_s17, 4 }
  0x78   : > { %s240_s9 = scalar_lea.sflag (!%p1576_p13), [#allocation3], %s1459_s17  ;;  %s1465_s15 = scalar_lea.vmem (!%p1576_p13), [#allocation2], %s733_s8 }
  0x7e   : > { %1185 = dma.done.wait (%p1577_p5), %s240_s9, 256  }
  0x7f   : > { %1187 = vsyncadd (%p1577_p5), %s240_s9, 4294967040  ;;  %p1578_p12 = scmp.eq.s32.totalorder %s1282_s22, 0 }
  0x81   : > { %1189 = dma.done.wait (%p1578_p12), [#allocation6], 32   ;;  %p1579_p8 = pmov %p1578_p12 }
  0x83   : > { %1191 = vsyncadd (%p1579_p8), [#allocation6], 4294967264  ;;  %p1580_p10 = pmov %p1579_p8 }
  0x84   : > { %p1581_p2 = pmov %p1579_p8 }
  0x85   : > { %1193 = dma.done.wait (%p1580_p10), [#allocation9], 6144  }
  0x86   : > { %1195 = vsyncadd (%p1581_p2), [#allocation9], 4294961152  ;;  %v375_v0 = vld [vmem:[#allocation8 + $0x80] sm:$0xff]  ;;  %v376_v1 = vld [vmem:[#allocation8 + $0x88] sm:$0xff]  ;;  %v306_v52 = vlaneseq  ;;  %s279_s24 = scalar_lea.vmem [#allocation10], %s733_s8  ;;  %p1582_p1 = scmp.ne.s32.totalorder %s1282_s22, 0 }
  0x87   : > { %v359_v2 = vld [vmem:[#allocation8] sm:$0xff]  ;;  %v847_v3 = vpack.c.bf16 %v376_v1, %v375_v0  ;;  %v360_v4 = vld [vmem:[#allocation8 + $0x8] sm:$0xff]  ;;  %v377_v9 = vld [vmem:[#allocation8 + $0x90] sm:$0xff] }
  0x88   : > { %v391_v5 = vld [vmem:[#allocation8 + $0x100] sm:$0xff]  ;;  %v392_v6 = vld [vmem:[#allocation8 + $0x108] sm:$0xff]  ;;  %v849_v7 = vpack.c.bf16 %v360_v4, %v359_v2  ;;  %v378_v10 = vld [vmem:[#allocation8 + $0x98] sm:$0xff] }
  0x89   : > { %v879_v8 = vpack.c.bf16 %v392_v6, %v391_v5  ;;  %v361_v11 = vld [vmem:[#allocation8 + $0x10] sm:$0xff]  ;;  %848 = vmatprep.subr.bf16.mxu0 %v847_v3  ;;  %v851_v12 = vpack.c.bf16 %v378_v10, %v377_v9  ;;  %v362_v13 = vld [vmem:[#allocation8 + $0x18] sm:$0xff]  ;;  %v379_v18 = vld [vmem:[#allocation8 + $0xa0] sm:$0xff]  ;;  %v307_v3 = vshrl.u32 %v306_v52, 7 }
  0x8a   : > { %v393_v14 = vld [vmem:[#allocation8 + $0x110] sm:$0xff]  ;;  %v394_v15 = vld [vmem:[#allocation8 + $0x118] sm:$0xff]  ;;  %850 = vmatpush3.bf16.msra.mxu0 %v849_v7  ;;  %v853_v16 = vpack.c.bf16 %v362_v13, %v361_v11  ;;  %v380_v19 = vld [vmem:[#allocation8 + $0xa8] sm:$0xff] }
  0x8b   : > { %880 = vmatprep.subr.bf16.mxu1 %v879_v8  ;;  %v883_v17 = vpack.c.bf16 %v394_v15, %v393_v14  ;;  %v363_v20 = vld [vmem:[#allocation8 + $0x20] sm:$0xff]  ;;  %852 = vmatprep.subr.bf16.mxu0 %v851_v12  ;;  %v855_v21 = vpack.c.bf16 %v380_v19, %v379_v18  ;;  %v364_v22 = vld [vmem:[#allocation8 + $0x28] sm:$0xff]  ;;  %v381_v26 = vld [vmem:[#allocation8 + $0xb0] sm:$0xff]  ;;  %vm350_vm0 = vcmp.lt.s32.totalorder %v307_v3, 7  ;;  %vm337_vm1 = vcmp.lt.s32.totalorder %v307_v3, 1 }
  0x8c   : > { %882 = vmatpush3.bf16.msra.mxu1 %v879_v8  ;;  %v395_v23 = vld [vmem:[#allocation8 + $0x120] sm:$0xff]  ;;  %v396_v24 = vld [vmem:[#allocation8 + $0x128] sm:$0xff]  ;;  %v382_v27 = vld [vmem:[#allocation8 + $0xb8] sm:$0xff]  ;;  %v857_v30 = vpack.c.bf16 %v364_v22, %v363_v20 }
  0x8d   : > { %884 = vmatprep.subr.bf16.mxu1 %v883_v17  ;;  %v887_v25 = vpack.c.bf16 %v396_v24, %v395_v23  ;;  %v397_v28 = vld [vmem:[#allocation8 + $0x130] sm:$0xff]  ;;  %v398_v29 = vld [vmem:[#allocation8 + $0x138] sm:$0xff]  ;;  %v859_v31 = vpack.c.bf16 %v382_v27, %v381_v26  ;;  %v383_v35 = vld [vmem:[#allocation8 + $0xc0] sm:$0xff]  ;;  %v313_v24 = vand.u32 15, %v307_v3 }
  0x8e   : > { %854 = vmatpush3.bf16.msra.mxu0 %v853_v16  ;;  %v365_v32 = vld [vmem:[#allocation8 + $0x30] sm:$0xff]  ;;  %v366_v33 = vld [vmem:[#allocation8 + $0x38] sm:$0xff]  ;;  %v891_v34 = vpack.c.bf16 %v398_v29, %v397_v28  ;;  %v384_v36 = vld [vmem:[#allocation8 + $0xc8] sm:$0xff] }
  0x8f   : > { %856 = vmatprep.subr.bf16.mxu0 %v855_v21  ;;  %v399_v37 = vld [vmem:[#allocation8 + $0x140] sm:$0xff]  ;;  %v400_v38 = vld [vmem:[#allocation8 + $0x148] sm:$0xff]  ;;  %v861_v39 = vpack.c.bf16 %v366_v33, %v365_v32  ;;  %v863_v40 = vpack.c.bf16 %v384_v36, %v383_v35  ;;  %v385_v44 = vld [vmem:[#allocation8 + $0xd0] sm:$0xff]  ;;  %v308_v21 = vadd.s32 8, %v307_v3  ;;  %vm754_vm2 = vcmp.ne.s32.totalorder %v313_v24, 0 }
  0x90   : > { %886 = vmatpush3.bf16.msra.mxu1 %v883_v17  ;;  %v367_v41 = vld [vmem:[#allocation8 + $0x40] sm:$0xff]  ;;  %v368_v42 = vld [vmem:[#allocation8 + $0x48] sm:$0xff]  ;;  %v895_v43 = vpack.c.bf16 %v400_v38, %v399_v37  ;;  %v386_v45 = vld [vmem:[#allocation8 + $0xd8] sm:$0xff] }
  0x91   : > { %888 = vmatprep.subr.bf16.mxu1 %v887_v25  ;;  %v401_v46 = vld [vmem:[#allocation8 + $0x150] sm:$0xff]  ;;  %v402_v47 = vld [vmem:[#allocation8 + $0x158] sm:$0xff]  ;;  %v865_v48 = vpack.c.bf16 %v368_v42, %v367_v41  ;;  %v867_v53 = vpack.c.bf16 %v386_v45, %v385_v44  ;;  %v387_v60 = vld [vmem:[#allocation8 + $0xe0] sm:$0xff]  ;;  %v320_v27 = vand.u32 15, %v308_v21  ;;  %v1226_v41 = vmov (!%p1582_p1), 0.0  }
  0x92   : > { %858 = vmatpush3.bf16.msra.mxu0 %v857_v30  ;;  %v284_v49 = vld [vmem:[%s1465_s15] sm:$0xff]  ;;  %v285_v50 = vld [vmem:[%s1465_s15 + $0x8] sm:$0xff]  ;;  %v899_v59 = vpack.c.bf16 %v402_v47, %v401_v46  ;;  %563 = vst [vmem:[#allocation11] sm:$0x3] (!%p1582_p1), %v1226_v41 }
  0x93   : > { %860 = vmatprep.subr.bf16.mxu0 %v859_v31  ;;  %v738_v51 = vld [vmem:[#allocation5] ss:$0 sm:$0xff]  ;;  %v369_v54 = vld [vmem:[#allocation8 + $0x50] sm:$0xff]  ;;  %v739_v58 = vld [vmem:[#allocation7] ss:$0 sm:$0xff]  ;;  %vm755_vm3 = vcmp.ne.s32.totalorder %v320_v27, 15 }
  0x94   : > { %890 = vmatpush3.bf16.msra.mxu1 %v887_v25  ;;  %v370_v55 = vld [vmem:[#allocation8 + $0x58] sm:$0xff]  ;;  %v293_v56 = vmul.f32 %v738_v51, %v284_v49  ;;  %v294_v57 = vmul.f32 %v738_v51, %v285_v50  ;;  %v388_v61 = vld [vmem:[#allocation8 + $0xe8] sm:$0xff]  ;;  %v403_v62 = vld [vmem:[#allocation8 + $0x160] sm:$0xff] }
  0x95   : > { %892 = vmatprep.subr.bf16.mxu1 %v891_v34  ;;  %v404_v63 = vld [vmem:[#allocation8 + $0x168] sm:$0xff]  ;;  %v869_v2 = vpack.c.bf16 %v370_v55, %v369_v54  ;;  %v871_v4 = vpack.c.bf16 %v388_v61, %v387_v60  ;;  %v371_v5 = vld [vmem:[#allocation8 + $0x60] sm:$0xff]  ;;  %v389_v10 = vld [vmem:[#allocation8 + $0xf0] sm:$0xff] }
  0x96   : > { %862 = vmatpush3.bf16.msra.mxu0 %v861_v39  ;;  %v302_v0 = vadd.f32 %v739_v58, %v293_v56  ;;  %v303_v1 = vadd.f32 %v739_v58, %v294_v57  ;;  %v372_v6 = vld [vmem:[#allocation8 + $0x68] sm:$0xff]  ;;  %v903_v9 = vpack.c.bf16 %v404_v63, %v403_v62  ;;  %v390_v11 = vld [vmem:[#allocation8 + $0xf8] sm:$0xff]  ;;  %v405_v12 = vld [vmem:[#allocation8 + $0x170] sm:$0xff] }
  0x97   : > { %864 = vmatprep.subr.bf16.mxu0 %v863_v40  ;;  %v406_v13 = vld [vmem:[#allocation8 + $0x178] sm:$0xff]  ;;  %v873_v16 = vpack.c.bf16 %v372_v6, %v371_v5  ;;  %v875_v17 = vpack.c.bf16 %v390_v11, %v389_v10  ;;  %v373_v18 = vld [vmem:[#allocation8 + $0x70] sm:$0xff] }
  0x98   : > { %894 = vmatpush3.bf16.msra.mxu1 %v891_v34  ;;  %v304_v7 = vmax.f32 %v302_v0, 0.0  ;;  %v305_v8 = vmax.f32 %v303_v1, 0.0  ;;  %v374_v19 = vld [vmem:[#allocation8 + $0x78] sm:$0xff]  ;;  %v907_v22 = vpack.c.bf16 %v406_v13, %v405_v12 }
  0x99   : > { %896 = vmatprep.subr.bf16.mxu1 %v895_v43  ;;  %v877_v23 = vpack.c.bf16 %v374_v19, %v373_v18 }
  0x9a   : > { %866 = vmatpush3.bf16.msra.mxu0 %v865_v48  ;;  %471 = vmatprep.mubr.f32.mxu0 %v304_v7  ;;  %v348_v14 = vrot.slane %v304_v7, 1  ;;  %v349_v15 = vrot.slane %v305_v8, 1  ;;  %v335_v25 = vrot.slane %v304_v7, 7  ;;  %v336_v26 = vrot.slane %v305_v8, 7 }
  0x9b   : > { %868 = vmatprep.subr.bf16.mxu0 %v867_v53 }
  0x9c   : > { %898 = vmatpush3.bf16.msra.mxu1 %v895_v43  ;;  %v351_v20 = vsel %vm350_vm0, %v348_v14, %v349_v15  ;;  %v339_v28 = vsel %vm337_vm1, %v336_v26, %v335_v25  ;;  %v352_v29 = vsel %vm350_vm0, %v349_v15, %v348_v14  ;;  %v338_v30 = vsel %vm337_vm1, %v335_v25, %v336_v26 }
  0x9d   : > { %900 = vmatprep.subr.bf16.mxu1 %v899_v59  ;;  %844 = vmatprep.mubr.f32.mxu1 %v351_v20 }
  0x9e   : > { %870 = vmatpush3.bf16.msra.mxu0 %v869_v2 }
  0x9f   : > { %872 = vmatprep.subr.bf16.mxu0 %v871_v4 }
  0xa0   : > { %902 = vmatpush3.bf16.msra.mxu1 %v899_v59 }
  0xa1   : > { %904 = vmatprep.subr.bf16.mxu1 %v903_v9 }
  0xa2   : > { %874 = vmatpush3.bf16.msra.mxu0 %v873_v16 }
  0xa3   : > { %876 = vmatprep.subr.bf16.mxu0 %v875_v17 }
  0xa4   : > { %906 = vmatpush3.bf16.msra.mxu1 %v903_v9 }
  0xa5   : > { %908 = vmatprep.subr.bf16.mxu1 %v907_v22 }
  0xa6   : > { %878 = vmatpush3.bf16.msra.mxu0 %v877_v23 }
  0xa8   : > { %910 = vmatpush3.bf16.msra.mxu1 %v907_v22 }
  0xa9   : > { %741 = vmatmul.mubr.msk.f32.vlgmr.msra.gmra.mrb[0].mxu0 %vm754_vm2, %v339_v28 }
  0xaa   : > { %476 = vmatprep.mubr.f32.mxu0 %v305_v8 }
  0xab   : > { %845 = vmatmul.mubr.msk.f32.vlgmr.msra.gmra.mrb[0].mxu1 %vm755_vm3, %v352_v29 }
  0xad   : > { %477 = vmatmul.mubr.f32.gmra.mrb[2].mxu0 %v338_v30 }
 0x17c   : > { %v788_v31 = vpop.f32.mrb[0].mxu0 }
 0x17d   : > { %v789_v32 = vpop.f32.mrb[1].mxu0 }
 0x17e   : > { %v846_v33 = vpop.f32.mrb[0].mxu1  ;;  %v790_v34 = vadd.f32 %v789_v32, %v788_v31 }
 0x17f   : > { %v548_v35 = vpop.f32.mrb[1].mxu1 }
 0x180   : > { %v549_v36 = vadd.f32 %v790_v34, %v548_v35  ;;  %v791_v37 = vpop.f32.mrb[2].mxu0  ;;  %562 = sbr.rel (%p1582_p1) target bundleno = 391 (0x187), region = 56 }
 0x181   : > { %v792_v38 = vpop.f32.mrb[3].mxu0 }
 0x182   : > { %557 = vst [vmem:[%s279_s24] sm:$0xff] %v549_v36  ;;  %v793_v39 = vadd.f32 %v792_v38, %v791_v37 }
 0x184   : > { %v554_v40 = vadd.f32 %v846_v33, %v793_v39 }
 0x186   : > { %558 = vst [vmem:[%s279_s24 + $0x8] sm:$0xff] %v554_v40 }
 0x187 PF: > { %v565_v42 = vadd.f32 %v554_v40, %v549_v36  ;;  %v572_v43 = vmul.f32 %v549_v36, %v549_v36  ;;  %v573_v44 = vmul.f32 %v554_v40, %v554_v40  ;;  %s753_s26 = sshll.u32 %s1282_s22, 8  ;;  %s599_s30 = sshll.u32 %s279_s24, 4  ;;  %s1493_s30 = int_to_ptr.vmem [resolvable:$true] %s599_s30 }
 0x188   : > { %s1491_s11 = scalar_lea.hbm %s1563_s4, %s753_s26  ;;  %s586_s28 = scalar_lea.sflag [#allocation4], %s1459_s17 }
 0x189   : > { %v566_v45 = vrot.slane %v565_v42, 4  ;;  %v574_v46 = vadd.f32 %v573_v44, %v572_v43  ;;  %s1114_s10 = scalar_lea.vmem %s1493_s30, 256  ;;  %s1227_s29 = smov [#allocation10]  }
 0x18a   : > { %p1115_p4 = scmp.ne.s32.totalorder %s1493_s30, %s1114_s10  ;;  %s1118_s12 = sshll.u32 %s1227_s29, 4  ;;  %s1119_s12 = int_to_ptr.vmem [resolvable:$false] %s1118_s12 }
 0x18b   : > { %v567_v47 = vadd.f32 %v566_v45, %v565_v42  ;;  %v575_v48 = vrot.slane %v574_v46, 4  ;;  %s1120_s23 = scalar_lea.vmem %s1119_s12, 512  ;;  %p1121_p7 = scmp.lt.s32.totalorder %s1493_s30, %s1119_s12 }
 0x18c   : > { %p1116_p9 = pnand %p1115_p4, %p1408_p6  ;;  %p1122_p11 = scmp.lt.s32.totalorder %s1120_s23, %s1114_s10 }
 0x18e   : > { %p1117_p3 = pneg %p1116_p9  ;;  %p1123_p0 = por %p1122_p11, %p1121_p7 }
 0x190   : > { %p1124_p13 = pnand %p1123_p0, %p1117_p3 }
 0x192   : > { %1127 = shalt.err (!%p1124_p13)
}
 0x193   : > { %s1128_s7 = scalar_lea.hbm %s1491_s11, 256  ;;  %s1132_s15 = scalar_lea.hbm %s1563_s4, 512 }
 0x194   : > { %p1129_p5 = scmp.ne.s32.totalorder %s1491_s11, %s1128_s7  ;;  %p1133_p10 = scmp.lt.u32.totalorder %s1491_s11, %s1563_s4 }
 0x195   : > { %p1134_p2 = scmp.lt.u32.totalorder %s1132_s15, %s1128_s7  ;;  %p1136_p4 = scmp.lt.u32.totalorder %s1128_s7, %s1491_s11 }
 0x196   : > { %p1130_p12 = pnand %p1129_p5, %p1408_p6 }
 0x197   : > { %p1135_p1 = por %p1134_p2, %p1133_p10 }
 0x198   : > { %p1131_p8 = pneg %p1130_p12 }
 0x199   : > { %p1137_p9 = por %p1136_p4, %p1135_p1 }
 0x19b   : > { %p1138_p3 = pnand %p1137_p9, %p1131_p8 }
 0x19d   : > { %1141 = shalt.err (!%p1138_p3)
}
 0x19e   : > { %s1228_s13 = smov 128   ;;  %s1229_s14 = smov 8   ;;  %v568_v49 = vrot.slane %v567_v47, 2  ;;  %v576_v50 = vadd.f32 %v575_v48, %v574_v46  ;;  %vm581_vm4 = vcmask 1040384   ;;  %v564_v57 = vld [vmem:[#allocation11] sm:$0x3] }
 0x19f   : > { %925 = dma.vmem_to_hbm [thread:$0]  (%p1408_p6), %s1493_s30, 256, %s1491_s11, %s586_s28, %s1228_s13, %s1228_s13, %s1229_s14  }
 0x1a0   : > { %v569_v51 = vadd.f32 %v568_v49, %v567_v47  ;;  %v577_v52 = vrot.slane %v576_v50, 2  ;;  %s1230_s10 = smov [#allocation11]   ;;  %p1583_p7 = scmp.eq.s32.totalorder %s1282_s22, 1 }
 0x1a1   : > { %s613_s29 = sshll.u32 %s1230_s10, 4  ;;  %s614_s29 = int_to_ptr.vmem [resolvable:$true] %s613_s29 }
 0x1a2   : > { %v570_v53 = vrot.slane %v569_v51, 1  ;;  %v578_v54 = vadd.f32 %v577_v52, %v576_v50  ;;  %s1142_s6 = scalar_lea.vmem %s614_s29, 32  ;;  %p1149_p13 = scmp.lt.s32.totalorder %s614_s29, %s614_s29 }
 0x1a3   : > { %p1143_p6 = scmp.ne.s32.totalorder %s614_s29, %s1142_s6  ;;  %p1150_p5 = scmp.lt.s32.totalorder %s1142_s6, %s1142_s6 }
 0x1a4   : > { %v571_v55 = vadd.f32 %v570_v53, %v569_v51  ;;  %v579_v56 = vrot.slane %v578_v54, 1 }
 0x1a5   : > { %p1144_p11 = pnand %p1143_p6, %p1583_p7  ;;  %p1151_p12 = por %p1150_p5, %p1149_p13 }
 0x1a6   : > { %v580_v58 = vadd.f32 %v579_v56, %v578_v54 }
 0x1a7   : > { %p1145_p0 = pneg %p1144_p11 }
 0x1a8   : > { %v582_v59 = vsel %vm581_vm4, %v571_v55, %v580_v58 }
 0x1a9   : > { %v583_v60 = vadd.f32 %v582_v59, %v564_v57  ;;  %p1152_p8 = pnand %p1151_p12, %p1145_p0 }
 0x1ab   : > { %584 = vst [vmem:[#allocation11] sm:$0x3] %v583_v60 }
 0x1ac   : > { %1155 = shalt.err (!%p1152_p8)
}
 0x1ad   : > { %s1156_s30 = scalar_lea.hbm %s1564_s5, 32  ;;  %p1584_p2 = pmov %p1583_p7 }
 0x1ae   : > { %p1157_p10 = scmp.ne.s32.totalorder %s1564_s5, %s1156_s30  ;;  %p1162_p9 = scmp.lt.u32.totalorder %s1156_s30, %s1564_s5 }
 0x1b0   : > { %p1158_p1 = pnand %p1157_p10, %p1584_p2 }
 0x1b2   : > { %p1159_p4 = pneg %p1158_p1 }
 0x1b4   : > { %p1164_p3 = pnand %p1162_p9, %p1159_p4 }
 0x1b6   : > { %1167 = shalt.err (!%p1164_p3)
}
 0x1b7   : > { %p1585_p6 = pmov %p1584_p2  ;;  %p1586_p7 = pmov %p1584_p2 }
 0x1b9   : > { %927 = dma.vmem_to_hbm [thread:$0]  (%p1585_p6), %s614_s29, 32, %s1564_s5, [#allocation12]  }
 0x1ba   : > { %1197 = dma.done.wait (%p1586_p7), [#allocation12], 32   ;;  %p1587_p11 = pmov %p1584_p2 }
 0x1bc   : > { %1199 = vsyncadd (%p1587_p11), [#allocation12], 4294967264 }
 0x1bd PF: > { %s629_s15 = sand.u32 1, %s1206_s18   ;;  %p1588_p0 = scmp.ne.s32.totalorder %s1569_s25, 0 }
 0x1be   : > { %p1589_p13 = scmp.ge.s32.totalorder %s1218_s21, 2  ;;  %s630_s24 = scalar_lea.sflag [#allocation4], %s629_s15 }
 0x1c0   : > { %p946_p5 = pnand %p1589_p13, %p1588_p0 }
 0x1c2   : > { %1201 = dma.done.wait (!%p946_p5), %s630_s24, 256  }
 0x1c3   : > { %1203 = vsyncadd (!%p946_p5), %s630_s24, 4294967040  ;;  %p22_p12 = scmp.ge.s32.totalorder %s1394_s16, 4   ;;  %s1590_s18 = smov %s1210_s19 }
 0x1c4   : > { %s1591_s19 = smov %s1214_s20  ;;  %s1592_s20 = smov %s1404_s27 }
 0x1c5   : > { %s1593_s21 = smov %s1394_s16  ;;  %24 = sbr.rel (!%p22_p12) target bundleno = 8 (0x8), region = 105 }
 0x1cc   :  { %635 = vsyncpa [#allocation3], 1 }
 0x1cd   :  { %637 = vsyncpa [#allocation3 + $0x1], 1 }
 0x1ce   :  { %638 = vsyncpa [#allocation6], 1 }
 0x1cf   :  { %639 = vsyncpa [#allocation9], 1 }
 0x1d0   :  { %640 = vsyncpa [#allocation4], 1 }
 0x1d1   :  { %642 = vsyncpa [#allocation4 + $0x1], 1 }
 0x1d2   :  { %643 = vsyncpa [#allocation12], 1 }

// kernel: bottleneck_forward.4
= control target key start
LH: loop header
LB: loop body
LE: loop exit
PB: predicated region body
PF: predicated region fallthrough
CT: control target
= control target key end

     0   :  { %10 = vsyncpa [#allocation3], 0  ;;  %s1247_s0 = inlined_call_operand.hbm [shape: f32[32,128], index: 0, kind: input, shape index: {}]   ;;  %s1248_s1 = inlined_call_operand.hbm [shape: f32[128,256], index: 1, kind: input, shape index: {}]   ;;  %s1249_s2 = inlined_call_operand.hbm [shape: f32[32,128], index: 2, kind: output, shape index: {0}]   ;;  %s1250_s3 = inlined_call_operand.hbm [shape: f32[32,128], index: 3, kind: output, shape index: {1}]   ;;  %s1251_s4 = inlined_call_operand.hbm [shape: f32[2,256], index: 4, kind: output, shape index: {2}]  }
   0x1   :  { %12 = vsyncpa [#allocation3 + $0x1], 0 }
   0x2   :  { %13 = vsyncpa [#allocation6], 0 }
   0x3   :  { %14 = vsyncpa [#allocation4], 0 }
   0x4   :  { %16 = vsyncpa [#allocation4 + $0x1], 0 }
   0x5   :  { %17 = vsyncpa [#allocation9], 0 }
   0x6   :  { %19 = vsyncpa [#allocation9 + $0x1], 0  ;;  %s965_s15 = smov 0   ;;  %s967_s16 = smov 0  }
   0x7   :  { %s969_s17 = smov 0   ;;  %s971_s18 = smov 0  }
   0x8 LB: > { %s986_s19 = sadd.s32 4294967295, %s924_s18   ;;  %s582_s20 = sadd.s32 4294967294, %s924_s18   ;;  %s924_s18 = sphi %s971_s18, %s1277_s18   ;;  %s920_s17 = sphi %s969_s17, %s1276_s17   ;;  %s916_s16 = sphi %s967_s16, %s1275_s16   ;;  %s912_s15 = sphi %s965_s15, %s1274_s15  }
   0x9   : > { %p45_p0 = scmp.ne.s32.totalorder %s916_s16, %s912_s15  ;;  %p1252_p1 = scmp.eq.s32.totalorder %s986_s19, 0 }
   0xa   : > { %p96_p3 = scmp.eq.s32.totalorder %s582_s20, 1  ;;  %p583_p5 = scmp.ge.s32.totalorder %s924_s18, 1 }
   0xb   : > { %p997_p4 = por %p1252_p1, %p45_p0  ;;  %p150_p7 = scmp.lt.s32.totalorder %s924_s18, 3 }
   0xc   : > { %p1002_p6 = por %p96_p3, %p45_p0  ;;  %s926_s24 = smov [#allocation5]  }
   0xd   : > { %s1255_s21 = scalar_select %p997_p4, 1, 0 }
   0xe   : > { %s1256_s22 = scalar_select %p1002_p6, 1, 0 }
   0xf   : > { %p1008_p9 = pnand %p583_p5, %p150_p7  ;;  %s162_s25 = sshll.u32 %s926_s24, 4  ;;  %s1012_s25 = int_to_ptr.vmem [resolvable:$true] %s162_s25 }
  0x10   : > { %s1024_s27 = sadd.s32 1, %s924_s18   ;;  %s32_s28 = sadd.s32 1, %s920_s17 }
  0x11   : > { %s1257_s23 = scalar_select %p1008_p9, 1, 0 }
  0x12   : > { %p670_p10 = pneg %p1008_p9  ;;  %s29_s29 = ssub.s32 %s924_s18, %s1024_s27 }
  0x13   : > { %s734_s6 = scalar_lea.hbm %s1248_s1, 4096 }
  0x14   : > { %p1019_p12 = pnand %p670_p10, %p1252_p1  ;;  %p735_p13 = scmp.ne.s32.totalorder %s1248_s1, %s734_s6 }
  0x15   : > { %p741_p7 = scmp.lt.u32.totalorder %s734_s6, %s1248_s1 }
  0x16   : > { %p736_p0 = pneg %p1019_p12 }
  0x18   : > { %p737_p3 = pnand %p736_p0, %p735_p13 }
  0x1a   : > { %p738_p5 = pneg %p737_p3 }
  0x1c   : > { %p743_p10 = pnand %p741_p7, %p738_p5 }
  0x1e   : > { %746 = shalt.err (!%p743_p10)
}
  0x1f   : > { %s747_s11 = scalar_lea.vmem %s1012_s25, 4096  ;;  %p755_p2 = scmp.lt.s32.totalorder %s1012_s25, %s1012_s25 }
  0x20   : > { %p748_p11 = scmp.ne.s32.totalorder %s1012_s25, %s747_s11  ;;  %p756_p6 = scmp.lt.s32.totalorder %s747_s11, %s747_s11 }
  0x22   : > { %p750_p8 = pnand %p748_p11, %p736_p0  ;;  %p757_p4 = por %p756_p6, %p755_p2 }
  0x24   : > { %p751_p1 = pneg %p750_p8 }
  0x26   : > { %p758_p9 = pnand %p757_p4, %p751_p1 }
  0x28   : > { %761 = shalt.err (!%p758_p9)
}
  0x29   : > { %s927_s12 = smov 256   ;;  %s928_s13 = smov 16  }
  0x2a   : > { %673 = dma.hbm_to_vmem [thread:$0]  (!%p1019_p12), %s1248_s1, 4096, %s1012_s25, [#allocation6], %s927_s12, %s927_s12, %s928_s13  }
  0x2b   : > { %p30_p2 = scmp.eq.s32.totalorder %s29_s29, 0  ;;  %p39_p1 = scmp.ne.s32.totalorder %s920_s17, %s916_s16 }
  0x2c   : > { %p40_p4 = scmp.eq.s32.totalorder %s924_s18, 0  ;;  %p686_p6 = scmp.lt.s32.totalorder %s924_s18, 2 }
  0x2d   : > { %s1055_s30 = scalar_select %p30_p2, %s920_s17, %s32_s28  }
  0x2e   : > { %p41_p8 = por %p40_p4, %p39_p1  ;;  %p1259_p9 = scmp.eq.s32.totalorder %s986_s19, 1 }
  0x2f   : > { %s176_s6 = sand.u32 1, %s920_s17   ;;  %s605_s7 = sshll.u32 %s924_s18, 8 }
  0x30   : > { %p1059_p11 = por %p1259_p9, %p39_p1  ;;  %s586_s8 = sshll.u32 %s176_s6, 4 }
  0x31   : > { %s1068_s10 = scalar_lea.hbm %s1247_s0, %s605_s7  ;;  %s180_s25 = scalar_lea.vmem [#allocation2], %s586_s8 }
  0x32   : > { %s187_s28 = sshll.u32 %s180_s25, 4  ;;  %p1070_p12 = pnand %p686_p6, %p41_p8  ;;  %s1074_s28 = int_to_ptr.vmem [resolvable:$true] %s187_s28 }
  0x33   : > { %s1076_s11 = scalar_lea.sflag [#allocation3], %s176_s6  ;;  %s762_s12 = scalar_lea.hbm %s1068_s10, 256 }
  0x34   : > { %p763_p13 = scmp.ne.s32.totalorder %s1068_s10, %s762_s12  ;;  %p764_p0 = pneg %p1070_p12 }
  0x35   : > { %s767_s24 = scalar_lea.hbm %s1247_s0, 512  ;;  %p768_p7 = scmp.lt.u32.totalorder %s1068_s10, %s1247_s0 }
  0x36   : > { %p765_p3 = pnand %p764_p0, %p763_p13  ;;  %p769_p10 = scmp.lt.u32.totalorder %s767_s24, %s762_s12 }
  0x37   : > { %p771_p1 = scmp.lt.u32.totalorder %s762_s12, %s1068_s10 }
  0x38   : > { %p766_p5 = pneg %p765_p3  ;;  %p770_p2 = por %p769_p10, %p768_p7 }
  0x3a   : > { %p772_p4 = por %p771_p1, %p770_p2 }
  0x3c   : > { %p773_p6 = pnand %p772_p4, %p766_p5 }
  0x3e   : > { %776 = shalt.err (!%p773_p6)
}
  0x3f   : > { %s777_s6 = scalar_lea.vmem %s1074_s28, 256  ;;  %s929_s26 = smov [#allocation2]  }
  0x40   : > { %p778_p8 = scmp.ne.s32.totalorder %s1074_s28, %s777_s6  ;;  %s782_s9 = sshll.u32 %s929_s26, 4  ;;  %s783_s9 = int_to_ptr.vmem [resolvable:$false] %s782_s9 }
  0x41   : > { %s784_s25 = scalar_lea.vmem %s783_s9, 512  ;;  %p785_p3 = scmp.lt.s32.totalorder %s1074_s28, %s783_s9 }
  0x42   : > { %p780_p9 = pnand %p778_p8, %p764_p0  ;;  %p786_p7 = scmp.lt.s32.totalorder %s784_s25, %s777_s6 }
  0x44   : > { %p781_p13 = pneg %p780_p9  ;;  %p787_p10 = por %p786_p7, %p785_p3 }
  0x46   : > { %p788_p2 = pnand %p787_p10, %p781_p13 }
  0x48   : > { %791 = shalt.err (!%p788_p2)
}
  0x49   : > { %s930_s12 = smov 128   ;;  %s931_s13 = smov 8  }
  0x4a   : > { %677 = dma.hbm_to_vmem [thread:$0]  (!%p1070_p12), %s1068_s10, 256, %s1074_s28, %s1076_s11, %s930_s12, %s930_s12, %s931_s13  }
  0x4b   : > { %p1262_p0 = scmp.ne.s32.totalorder %s1257_s23, 0 }
  0x4c   : > { %s1107_s14 = sand.u32 (!%p1262_p0), 1, %s916_s16   ;;  %p1263_p5 = scmp.ne.s32.totalorder (!%p1262_p0), %s1255_s21, 0 }
  0x4d   : > { %199 = sbr.rel (%p1262_p0) target bundleno = 418 (0x1a2), region = 28  ;;  %s1110_s24 = sshll.u32 (!%p1262_p0), %s1107_s14, 4 }
  0x4e   : > { %s202_s7 = scalar_lea.sflag (!%p1262_p0), [#allocation3], %s1107_s14  ;;  %s205_s8 = scalar_lea.vmem (!%p1262_p0), [#allocation2], %s1110_s24 }
  0x54   : > { %891 = dma.done.wait (%p1263_p5), %s202_s7, 256  }
  0x55   : > { %893 = vsyncadd (%p1263_p5), %s202_s7, 4294967040  ;;  %p1264_p12 = scmp.eq.s32.totalorder %s986_s19, 0 }
  0x57   : > { %895 = dma.done.wait (%p1264_p12), [#allocation6], 4096   ;;  %p1265_p1 = pmov %p1264_p12 }
  0x58   : > { %v932_v0 = vmov 0.0   ;;  %v245_v1 = vld [vmem:[#allocation5 + $0x8] sm:$0xff]  ;;  %v247_v2 = vld [vmem:[#allocation5 + $0x18] sm:$0xff]  ;;  %v244_v3 = vld [vmem:[#allocation5] sm:$0xff]  ;;  %s1127_s21 = scalar_lea.vmem [#allocation7], %s1110_s24  ;;  %s236_s23 = scalar_lea.vmem [#allocation8], %s1110_s24 }
  0x59   : > { %897 = vsyncadd (%p1265_p1), [#allocation6], 4294963200  ;;  %340 = vmatprep.mubr.f32.mxu0 %v932_v0  ;;  %346 = vmatprep.mubr.f32.mxu1 %v932_v0  ;;  %v608_v4 = vpack.c.bf16 %v247_v2, %v245_v1  ;;  %v246_v5 = vld [vmem:[#allocation5 + $0x10] sm:$0xff]  ;;  %v249_v6 = vld [vmem:[#allocation5 + $0x28] sm:$0xff]  ;;  %p1266_p4 = scmp.ne.s32.totalorder %s986_s19, 0 }
  0x5a   : > { %v251_v7 = vld [vmem:[#allocation5 + $0x38] sm:$0xff]  ;;  %v610_v8 = vpack.c.bf16 %v246_v5, %v244_v3  ;;  %v248_v10 = vld [vmem:[#allocation5 + $0x20] sm:$0xff]  ;;  %v250_v11 = vld [vmem:[#allocation5 + $0x30] sm:$0xff]  ;;  %v933_v55 = vmov (!%p1266_p4), 0.0  }
  0x5b   : > { %v612_v9 = vpack.c.bf16 %v251_v7, %v249_v6  ;;  %v253_v12 = vld [vmem:[#allocation5 + $0x48] sm:$0xff]  ;;  %609 = vmatprep.subr.bf16.mxu0 %v608_v4  ;;  %640 = vmatprep.subr.bf16.mxu1 %v608_v4  ;;  %v255_v13 = vld [vmem:[#allocation5 + $0x58] sm:$0xff]  ;;  %v614_v14 = vpack.c.bf16 %v250_v11, %v248_v10  ;;  %v252_v16 = vld [vmem:[#allocation5 + $0x40] sm:$0xff]  ;;  %361 = vst [vmem:[#allocation10] sm:$0xf] (!%p1266_p4), %v933_v55 }
  0x5c   : > { %611 = vmatpush1.bf16.msra.mxu0 %v610_v8  ;;  %648 = vmatpush1.bf16.msra.mxu1 %v610_v8  ;;  %v616_v15 = vpack.c.bf16 %v255_v13, %v253_v12  ;;  %v254_v17 = vld [vmem:[#allocation5 + $0x50] sm:$0xff]  ;;  %v257_v18 = vld [vmem:[#allocation5 + $0x68] sm:$0xff]  ;;  %v259_v19 = vld [vmem:[#allocation5 + $0x78] sm:$0xff] }
  0x5d   : > { %613 = vmatprep.subr.bf16.mxu0 %v612_v9  ;;  %641 = vmatprep.subr.bf16.mxu1 %v612_v9  ;;  %v618_v20 = vpack.c.bf16 %v254_v17, %v252_v16  ;;  %v620_v21 = vpack.c.bf16 %v259_v19, %v257_v18  ;;  %v256_v22 = vld [vmem:[#allocation5 + $0x60] sm:$0xff]  ;;  %v258_v23 = vld [vmem:[#allocation5 + $0x70] sm:$0xff]  ;;  %v261_v24 = vld [vmem:[#allocation5 + $0x88] sm:$0xff] }
  0x5e   : > { %v263_v25 = vld [vmem:[#allocation5 + $0x98] sm:$0xff]  ;;  %v622_v26 = vpack.c.bf16 %v258_v23, %v256_v22  ;;  %v260_v28 = vld [vmem:[#allocation5 + $0x80] sm:$0xff]  ;;  %v262_v29 = vld [vmem:[#allocation5 + $0x90] sm:$0xff] }
  0x5f   : > { %v624_v27 = vpack.c.bf16 %v263_v25, %v261_v24  ;;  %v265_v30 = vld [vmem:[#allocation5 + $0xa8] sm:$0xff]  ;;  %v267_v31 = vld [vmem:[#allocation5 + $0xb8] sm:$0xff]  ;;  %v626_v32 = vpack.c.bf16 %v262_v29, %v260_v28  ;;  %v264_v34 = vld [vmem:[#allocation5 + $0xa0] sm:$0xff] }
  0x60   : > { %615 = vmatpush1.bf16.msra.mxu0 %v614_v14  ;;  %649 = vmatpush1.bf16.msra.mxu1 %v614_v14  ;;  %v628_v33 = vpack.c.bf16 %v267_v31, %v265_v30  ;;  %v266_v35 = vld [vmem:[#allocation5 + $0xb0] sm:$0xff]  ;;  %v269_v36 = vld [vmem:[#allocation5 + $0xc8] sm:$0xff]  ;;  %v271_v37 = vld [vmem:[#allocation5 + $0xd8] sm:$0xff] }
  0x61   : > { %617 = vmatprep.subr.bf16.mxu0 %v616_v15  ;;  %642 = vmatprep.subr.bf16.mxu1 %v616_v15  ;;  %v630_v38 = vpack.c.bf16 %v266_v35, %v264_v34  ;;  %v632_v39 = vpack.c.bf16 %v271_v37, %v269_v36  ;;  %v268_v40 = vld [vmem:[#allocation5 + $0xc0] sm:$0xff]  ;;  %v270_v41 = vld [vmem:[#allocation5 + $0xd0] sm:$0xff]  ;;  %v273_v42 = vld [vmem:[#allocation5 + $0xe8] sm:$0xff] }
  0x62   : > { %v275_v43 = vld [vmem:[#allocation5 + $0xf8] sm:$0xff]  ;;  %v634_v44 = vpack.c.bf16 %v270_v41, %v268_v40  ;;  %v272_v46 = vld [vmem:[#allocation5 + $0xe0] sm:$0xff]  ;;  %v274_v47 = vld [vmem:[#allocation5 + $0xf0] sm:$0xff] }
  0x63   : > { %v636_v45 = vpack.c.bf16 %v275_v43, %v273_v42  ;;  %v638_v48 = vpack.c.bf16 %v274_v47, %v272_v46  ;;  %v242_v49 = vld [vmem:[%s205_s8] sm:$0xff]  ;;  %v243_v50 = vld [vmem:[%s205_s8 + $0x8] sm:$0xff] }
  0x64   : > { %619 = vmatpush1.bf16.msra.mxu0 %v618_v20  ;;  %650 = vmatpush1.bf16.msra.mxu1 %v618_v20 }
  0x65   : > { %621 = vmatprep.subr.bf16.mxu0 %v620_v21  ;;  %643 = vmatprep.subr.bf16.mxu1 %v620_v21 }
  0x68   : > { %623 = vmatpush1.bf16.msra.mxu0 %v622_v26  ;;  %651 = vmatpush1.bf16.msra.mxu1 %v622_v26 }
  0x69   : > { %625 = vmatprep.subr.bf16.mxu0 %v624_v27  ;;  %644 = vmatprep.subr.bf16.mxu1 %v624_v27 }
  0x6c   : > { %627 = vmatpush1.bf16.msra.mxu0 %v626_v32  ;;  %652 = vmatpush1.bf16.msra.mxu1 %v626_v32 }
  0x6d   : > { %629 = vmatprep.subr.bf16.mxu0 %v628_v33  ;;  %645 = vmatprep.subr.bf16.mxu1 %v628_v33 }
  0x70   : > { %631 = vmatpush1.bf16.msra.mxu0 %v630_v38  ;;  %653 = vmatpush1.bf16.msra.mxu1 %v630_v38 }
  0x71   : > { %633 = vmatprep.subr.bf16.mxu0 %v632_v39  ;;  %646 = vmatprep.subr.bf16.mxu1 %v632_v39 }
  0x74   : > { %635 = vmatpush1.bf16.msra.mxu0 %v634_v44  ;;  %654 = vmatpush1.bf16.msra.mxu1 %v634_v44 }
  0x75   : > { %637 = vmatprep.subr.bf16.mxu0 %v636_v45  ;;  %647 = vmatprep.subr.bf16.mxu1 %v636_v45 }
  0x78   : > { %639 = vmatpush1.bf16.msra.mxu0 %v638_v48  ;;  %655 = vmatpush1.bf16.msra.mxu1 %v638_v48 }
  0x7b   : > { %341 = vmatmul.mubr.f32.vlgmr.msra.gmra.mrb[0].mxu0 %v242_v49  ;;  %347 = vmatmul.mubr.f32.vlgmr.msra.gmra.mrb[0].mxu1 %v243_v50 }
 0x14a   : > { %360 = sbr.rel (%p1266_p4) target bundleno = 337 (0x151), region = 40 }
 0x14e   : > { %v342_v51 = vpop.f32.mrb[0].mxu0  ;;  %v348_v52 = vpop.f32.mrb[0].mxu1 }
 0x14f   : > { %353 = vst [vmem:[%s1127_s21] sm:$0xff] %v342_v51  ;;  %354 = vst [vmem:[%s1127_s21 + $0x8] sm:$0xff] %v348_v52  ;;  %v344_v53 = vpop.f32.mrb[1].mxu0  ;;  %v350_v54 = vpop.f32.mrb[1].mxu1 }
 0x150   : > { %355 = vst [vmem:[%s236_s23] sm:$0xff] %v344_v53  ;;  %356 = vst [vmem:[%s236_s23 + $0x8] sm:$0xff] %v350_v54 }
 0x151 PF: > { %v363_v56 = vadd.f32 %v348_v52, %v342_v51  ;;  %v370_v57 = vadd.f32 %v350_v54, %v344_v53  ;;  %v377_v58 = vmul.f32 %v342_v51, %v342_v51  ;;  %v378_v59 = vmul.f32 %v344_v53, %v344_v53  ;;  %s416_s10 = sand.u32 1, %s986_s19   ;;  %s606_s28 = sshll.u32 %s986_s19, 8 }
 0x152   : > { %v379_v60 = vmul.f32 %v348_v52, %v348_v52  ;;  %v380_v61 = vmul.f32 %v350_v54, %v350_v54  ;;  %s1139_s6 = scalar_lea.hbm %s1250_s3, %s606_s28  ;;  %s446_s26 = sshll.u32 %s236_s23, 4  ;;  %s1141_s26 = int_to_ptr.vmem [resolvable:$true] %s446_s26 }
 0x153   : > { %v364_v62 = vrot.slane %v363_v56, 4  ;;  %v371_v63 = vrot.slane %v370_v57, 4  ;;  %s1146_s12 = scalar_lea.hbm %s1249_s2, %s606_s28  ;;  %s1148_s13 = scalar_lea.sflag [#allocation9], %s416_s10 }
 0x154   : > { %v381_v0 = vadd.f32 %v379_v60, %v377_v58  ;;  %v388_v1 = vadd.f32 %v380_v61, %v378_v59  ;;  %s792_s24 = scalar_lea.vmem %s1141_s26, 256  ;;  %s934_s7 = smov [#allocation8]  }
 0x155   : > { %v365_v2 = vadd.f32 %v364_v62, %v363_v56  ;;  %v372_v3 = vadd.f32 %v371_v63, %v370_v57  ;;  %p793_p6 = scmp.ne.s32.totalorder %s1141_s26, %s792_s24  ;;  %s796_s8 = sshll.u32 %s934_s7, 4  ;;  %s797_s8 = int_to_ptr.vmem [resolvable:$false] %s796_s8 }
 0x156   : > { %v382_v4 = vrot.slane %v381_v0, 4  ;;  %v389_v5 = vrot.slane %v388_v1, 4  ;;  %s798_s23 = scalar_lea.vmem %s797_s8, 512  ;;  %p799_p13 = scmp.lt.s32.totalorder %s1141_s26, %s797_s8 }
 0x157   : > { %p794_p8 = pnand %p793_p6, %p1059_p11  ;;  %p800_p3 = scmp.lt.s32.totalorder %s798_s23, %s792_s24 }
 0x159   : > { %p795_p9 = pneg %p794_p8  ;;  %p801_p7 = por %p800_p3, %p799_p13 }
 0x15b   : > { %p802_p10 = pnand %p801_p7, %p795_p9 }
 0x15d   : > { %805 = shalt.err (!%p802_p10)
}
 0x15e   : > { %s806_s10 = scalar_lea.hbm %s1139_s6, 256  ;;  %s810_s11 = scalar_lea.hbm %s1250_s3, 512 }
 0x15f   : > { %p807_p2 = scmp.ne.s32.totalorder %s1139_s6, %s806_s10  ;;  %p811_p12 = scmp.lt.u32.totalorder %s1139_s6, %s1250_s3 }
 0x160   : > { %p812_p1 = scmp.lt.u32.totalorder %s810_s11, %s806_s10  ;;  %p814_p6 = scmp.lt.u32.totalorder %s806_s10, %s1139_s6 }
 0x161   : > { %p808_p0 = pnand %p807_p2, %p1059_p11 }
 0x162   : > { %p813_p4 = por %p812_p1, %p811_p12 }
 0x163   : > { %p809_p5 = pneg %p808_p0 }
 0x164   : > { %p815_p8 = por %p814_p6, %p813_p4 }
 0x166   : > { %p816_p9 = pnand %p815_p8, %p809_p5 }
 0x168   : > { %819 = shalt.err (!%p816_p9)
}
 0x169   : > { %s935_s24 = smov 128   ;;  %s936_s7 = smov 8   ;;  %v366_v6 = vrot.slane %v365_v2, 2  ;;  %v373_v7 = vrot.slane %v372_v3, 2  ;;  %v383_v8 = vadd.f32 %v382_v4, %v381_v0  ;;  %v390_v9 = vadd.f32 %v389_v5, %v388_v1 }
 0x16a   : > { %663 = dma.vmem_to_hbm [thread:$0]  (%p1059_p11), %s1141_s26, 256, %s1139_s6, %s1148_s13, %s935_s24, %s935_s24, %s936_s7   ;;  %v937_v12 = vmov 1983009808   ;;  %v404_v14 = vlaneseq }
 0x16b   : > { %s430_s8 = sshll.u32 %s1127_s21, 4  ;;  %v367_v10 = vadd.f32 %v366_v6, %v365_v2  ;;  %v374_v11 = vadd.f32 %v373_v7, %v372_v3  ;;  %v402_v13 = vunpack.c.l.s4 %v937_v12  ;;  %s412_s23 = scalar_lea.sflag [#allocation4], %s1107_s14  ;;  %s1176_s8 = int_to_ptr.vmem [resolvable:$true] %s430_s8 }
 0x16c   : > { %s820_s10 = scalar_lea.vmem %s1176_s8, 256  ;;  %s938_s6 = smov [#allocation7]  }
 0x16d   : > { %p821_p13 = scmp.ne.s32.totalorder %s1176_s8, %s820_s10  ;;  %s824_s21 = sshll.u32 %s938_s6, 4  ;;  %s825_s21 = int_to_ptr.vmem [resolvable:$false] %s824_s21 }
 0x16e   : > { %s826_s26 = scalar_lea.vmem %s825_s21, 512  ;;  %p827_p10 = scmp.lt.s32.totalorder %s1176_s8, %s825_s21 }
 0x16f   : > { %p822_p3 = pnand %p821_p13, %p1059_p11  ;;  %p828_p2 = scmp.lt.s32.totalorder %s826_s26, %s820_s10 }
 0x171   : > { %p823_p7 = pneg %p822_p3  ;;  %p829_p0 = por %p828_p2, %p827_p10 }
 0x173   : > { %p830_p5 = pnand %p829_p0, %p823_p7 }
 0x175   : > { %833 = shalt.err (!%p830_p5)
}
 0x176   : > { %s834_s13 = scalar_lea.hbm %s1146_s12, 256  ;;  %s838_s11 = scalar_lea.hbm %s1249_s2, 512 }
 0x177   : > { %p835_p12 = scmp.ne.s32.totalorder %s1146_s12, %s834_s13  ;;  %p839_p6 = scmp.lt.u32.totalorder %s1146_s12, %s1249_s2 }
 0x178   : > { %p840_p8 = scmp.lt.u32.totalorder %s838_s11, %s834_s13  ;;  %p842_p13 = scmp.lt.u32.totalorder %s834_s13, %s1146_s12 }
 0x179   : > { %p836_p1 = pnand %p835_p12, %p1059_p11 }
 0x17a   : > { %p841_p9 = por %p840_p8, %p839_p6 }
 0x17b   : > { %p837_p4 = pneg %p836_p1 }
 0x17c   : > { %p843_p3 = por %p842_p13, %p841_p9 }
 0x17e   : > { %p844_p7 = pnand %p843_p3, %p837_p4 }
 0x180   : > { %847 = shalt.err (!%p844_p7)
}
 0x181   : > { %662 = dma.vmem_to_hbm [thread:$0]  (%p1059_p11), %s1176_s8, 256, %s1146_s12, %s412_s23, %s935_s24, %s935_s24, %s936_s7   ;;  %v384_v15 = vrot.slane %v383_v8, 2  ;;  %v391_v16 = vrot.slane %v390_v9, 2  ;;  %v368_v17 = vrot.slane %v367_v10, 1  ;;  %v375_v18 = vrot.slane %v374_v11, 1 }
 0x182   : > { %v403_v21 = vunpack.c.0.s8 %v402_v13  ;;  %v405_v22 = vshrl.u32 %v404_v14, 7  ;;  %vm395_vm0 = vcmask 1040384   ;;  %v362_v33 = vld [vmem:[#allocation10] sm:$0xf]  ;;  %s939_s5 = smov [#allocation10]   ;;  %p1267_p10 = scmp.eq.s32.totalorder %s986_s19, 1 }
 0x183   : > { %v385_v19 = vadd.f32 %v384_v15, %v383_v8  ;;  %v392_v20 = vadd.f32 %v391_v16, %v390_v9  ;;  %v369_v23 = vadd.f32 %v368_v17, %v367_v10  ;;  %v376_v24 = vadd.f32 %v375_v18, %v374_v11  ;;  %s460_s14 = sshll.u32 %s939_s5, 4  ;;  %s461_s14 = int_to_ptr.vmem [resolvable:$true] %s460_s14 }
 0x184   : > { %v406_v29 = vsub.s32 %v403_v21, %v405_v22  ;;  %s848_s12 = scalar_lea.vmem %s461_s14, 64  ;;  %p855_p5 = scmp.lt.s32.totalorder %s461_s14, %s461_s14 }
 0x185   : > { %v386_v25 = vrot.slane %v385_v19, 1  ;;  %v393_v26 = vrot.slane %v392_v20, 1  ;;  %p849_p11 = scmp.ne.s32.totalorder %s461_s14, %s848_s12  ;;  %p856_p12 = scmp.lt.s32.totalorder %s848_s12, %s848_s12 }
 0x187   : > { %v387_v27 = vadd.f32 %v386_v25, %v385_v19  ;;  %v394_v28 = vadd.f32 %v393_v26, %v392_v20  ;;  %p850_p2 = pnand %p849_p11, %p1267_p10  ;;  %p857_p1 = por %p856_p12, %p855_p5 }
 0x189   : > { %v396_v30 = vsel %vm395_vm0, %v369_v23, %v387_v27  ;;  %v397_v31 = vsel %vm395_vm0, %v376_v24, %v394_v28  ;;  %p851_p0 = pneg %p850_p2 }
 0x18a   : > { %v400_v32 = vcombine.low %v396_v30, %v397_v31 }
 0x18b   : > { %p858_p4 = pnand %p857_p1, %p851_p0 }
 0x18c   : > { %v407_v34 = vrot.slane %v400_v32, %v406_v29 }
 0x18e   : > { %v409_v35 = vadd.f32 %v407_v34, %v362_v33 }
 0x190   : > { %410 = vst [vmem:[#allocation10] sm:$0xf] %v409_v35 }
 0x191   : > { %861 = shalt.err (!%p858_p4)
}
 0x192   : > { %s862_s8 = scalar_lea.hbm %s1251_s4, 64  ;;  %p1268_p8 = pmov %p1267_p10 }
 0x193   : > { %p863_p6 = scmp.ne.s32.totalorder %s1251_s4, %s862_s8  ;;  %p868_p3 = scmp.lt.u32.totalorder %s862_s8, %s1251_s4 }
 0x195   : > { %p864_p9 = pnand %p863_p6, %p1268_p8 }
 0x197   : > { %p865_p13 = pneg %p864_p9 }
 0x199   : > { %p870_p7 = pnand %p868_p3, %p865_p13 }
 0x19b   : > { %873 = shalt.err (!%p870_p7)
}
 0x19c   : > { %p1269_p11 = pmov %p1268_p8  ;;  %p1270_p10 = pmov %p1268_p8 }
 0x19e   : > { %665 = dma.vmem_to_hbm [thread:$0]  (%p1269_p11), %s461_s14, 64, %s1251_s4, [#allocation9]  }
 0x19f   : > { %899 = dma.done.wait (%p1270_p10), [#allocation9], 64   ;;  %p1271_p2 = pmov %p1268_p8 }
 0x1a1   : > { %901 = vsyncadd (%p1271_p2), [#allocation9], 4294967232 }
 0x1a2 PF: > { %s476_s28 = sand.u32 1, %s912_s15   ;;  %p1272_p0 = scmp.ne.s32.totalorder %s1256_s22, 0 }
 0x1a3   : > { %p1273_p5 = scmp.ge.s32.totalorder %s924_s18, 2  ;;  %s477_s29 = scalar_lea.sflag [#allocation4], %s476_s28 }
 0x1a5   : > { %p679_p12 = pnand %p1273_p5, %p1272_p0 }
 0x1a7   : > { %903 = dma.done.wait (!%p679_p12), %s477_s29, 256  }
 0x1a8   : > { %905 = vsyncadd (!%p679_p12), %s477_s29, 4294967040  ;;  %s485_s11 = sand.u32 1, %s582_s20  }
 0x1a9   : > { %s486_s9 = scalar_lea.sflag [#allocation9], %s485_s11 }
 0x1aa   : > { %907 = dma.done.wait (!%p679_p12), %s486_s9, 256  }
 0x1ab   : > { %909 = vsyncadd (!%p679_p12), %s486_s9, 4294967040  ;;  %p22_p1 = scmp.ge.s32.totalorder %s1024_s27, 4   ;;  %s1274_s15 = smov %s916_s16 }
 0x1ac   : > { %s1275_s16 = smov %s920_s17  ;;  %s1276_s17 = smov %s1055_s30 }
 0x1ad   : > { %s1277_s18 = smov %s1024_s27  ;;  %24 = sbr.rel (!%p22_p1) target bundleno = 8 (0x8), region = 106 }
 0x1b4   :  { %491 = vsyncpa [#allocation3], 1 }
 0x1b5   :  { %493 = vsyncpa [#allocation3 + $0x1], 1 }
 0x1b6   :  { %494 = vsyncpa [#allocation6], 1 }
 0x1b7   :  { %495 = vsyncpa [#allocation4], 1 }
 0x1b8   :  { %497 = vsyncpa [#allocation4 + $0x1], 1 }
 0x1b9   :  { %498 = vsyncpa [#allocation9], 1 }
 0x1ba   :  { %500 = vsyncpa [#allocation9 + $0x1], 1 }

// kernel: bottleneck_forward.6
= control target key start
LH: loop header
LB: loop body
LE: loop exit
PB: predicated region body
PF: predicated region fallthrough
CT: control target
= control target key end

     0   :  { %11 = vsyncpa [#allocation3], 0  ;;  %s1321_s0 = inlined_call_operand.hbm [shape: f32[32,128], index: 0, kind: input, shape index: {}]   ;;  %s1322_s1 = inlined_call_operand.hbm [shape: f32[1,128], index: 1, kind: input, shape index: {}]   ;;  %s1323_s2 = inlined_call_operand.hbm [shape: f32[1,128], index: 2, kind: input, shape index: {}]   ;;  %s1324_s3 = inlined_call_operand.hbm [shape: f32[128,128], index: 3, kind: input, shape index: {}]   ;;  %s1325_s4 = inlined_call_operand.hbm [shape: f32[32,128], index: 4, kind: output, shape index: {0}]   ;;  %s1326_s5 = inlined_call_operand.hbm [shape: f32[2,128], index: 5, kind: output, shape index: {1}]  }
   0x1   :  { %13 = vsyncpa [#allocation3 + $0x1], 0 }
   0x2   :  { %14 = vsyncpa [#allocation6], 0 }
   0x3   :  { %15 = vsyncpa [#allocation9], 0 }
   0x4   :  { %16 = vsyncpa [#allocation4], 0 }
   0x5   :  { %18 = vsyncpa [#allocation4 + $0x1], 0 }
   0x6   :  { %19 = vsyncpa [#allocation12], 0  ;;  %s1025_s18 = smov 0   ;;  %s1027_s19 = smov 0  }
   0x7   :  { %s1029_s20 = smov 0   ;;  %s1031_s21 = smov 0  }
   0x8 LB: > { %s1046_s22 = sadd.s32 4294967295, %s982_s21   ;;  %s563_s23 = sadd.s32 4294967294, %s982_s21   ;;  %s982_s21 = sphi %s1031_s21, %s1355_s21   ;;  %s978_s20 = sphi %s1029_s20, %s1354_s20   ;;  %s974_s19 = sphi %s1027_s19, %s1353_s19   ;;  %s970_s18 = sphi %s1025_s18, %s1352_s18  }
   0x9   : > { %p45_p0 = scmp.ne.s32.totalorder %s974_s19, %s970_s18  ;;  %p1327_p1 = scmp.eq.s32.totalorder %s1046_s22, 0 }
   0xa   : > { %p138_p3 = scmp.eq.s32.totalorder %s563_s23, 1  ;;  %p564_p5 = scmp.ge.s32.totalorder %s982_s21, 1 }
   0xb   : > { %p1055_p4 = por %p1327_p1, %p45_p0  ;;  %p166_p7 = scmp.lt.s32.totalorder %s982_s21, 3 }
   0xc   : > { %p1060_p6 = por %p138_p3, %p45_p0  ;;  %s984_s27 = smov [#allocation5]  }
   0xd   : > { %s1330_s24 = scalar_select %p1055_p4, 1, 0 }
   0xe   : > { %s1331_s25 = scalar_select %p1060_p6, 1, 0 }
   0xf   : > { %p1066_p9 = pnand %p564_p5, %p166_p7  ;;  %s179_s28 = sshll.u32 %s984_s27, 4  ;;  %s180_s28 = int_to_ptr.vmem [resolvable:$true] %s179_s28 }
  0x10   : > { %s985_s29 = smov [#allocation7]   ;;  %s986_s7 = smov [#allocation8]  }
  0x11   : > { %s1332_s26 = scalar_select %p1066_p9, 1, 0 }
  0x12   : > { %p695_p11 = pneg %p1066_p9  ;;  %s190_s30 = sshll.u32 %s985_s29, 4  ;;  %s1079_s30 = int_to_ptr.vmem [resolvable:$true] %s190_s30 }
  0x13   : > { %s200_s8 = sshll.u32 %s986_s7, 4  ;;  %s764_s11 = scalar_lea.hbm %s1322_s1, 16  ;;  %s1081_s8 = int_to_ptr.vmem [resolvable:$true] %s200_s8 }
  0x14   : > { %p1075_p12 = pnand %p695_p11, %p1327_p1  ;;  %p765_p13 = scmp.ne.s32.totalorder %s1322_s1, %s764_s11 }
  0x15   : > { %p771_p7 = scmp.lt.u32.totalorder %s764_s11, %s1322_s1 }
  0x16   : > { %p1091_p0 = pneg %p1075_p12 }
  0x18   : > { %p767_p3 = pnand %p1091_p0, %p765_p13 }
  0x1a   : > { %p768_p5 = pneg %p767_p3 }
  0x1c   : > { %p773_p11 = pnand %p771_p7, %p768_p5 }
  0x1e   : > { %776 = shalt.err (!%p773_p11)
}
  0x1f   : > { %s777_s17 = scalar_lea.vmem %s180_s28, 16  ;;  %s784_s23 = scalar_lea.vmem %s180_s28, 32 }
  0x20   : > { %p778_p10 = scmp.ne.s32.totalorder %s180_s28, %s777_s17  ;;  %p785_p2 = scmp.lt.s32.totalorder %s180_s28, %s180_s28 }
  0x21   : > { %p786_p6 = scmp.lt.s32.totalorder %s784_s23, %s777_s17 }
  0x22   : > { %p780_p8 = pnand %p778_p10, %p1091_p0 }
  0x23   : > { %p787_p4 = por %p786_p6, %p785_p2 }
  0x24   : > { %p781_p1 = pneg %p780_p8 }
  0x26   : > { %p788_p9 = pnand %p787_p4, %p781_p1 }
  0x28   : > { %791 = shalt.err (!%p788_p9)
}
  0x29   : > { %698 = dma.hbm_to_vmem [thread:$0]  (!%p1075_p12), %s1322_s1, 16, %s180_s28, [#allocation6]  }
  0x2a   : > { %s792_s10 = scalar_lea.hbm %s1323_s2, 16 }
  0x2b   : > { %p793_p8 = scmp.ne.s32.totalorder %s1323_s2, %s792_s10  ;;  %p799_p1 = scmp.lt.u32.totalorder %s792_s10, %s1323_s2 }
  0x2d   : > { %p795_p10 = pnand %p793_p8, %p1091_p0 }
  0x2f   : > { %p796_p2 = pneg %p795_p10 }
  0x31   : > { %p801_p4 = pnand %p799_p1, %p796_p2 }
  0x33   : > { %804 = shalt.err (!%p801_p4)
}
  0x34   : > { %s805_s28 = scalar_lea.vmem %s1079_s30, 16  ;;  %s812_s16 = scalar_lea.vmem %s1079_s30, 32 }
  0x35   : > { %p806_p6 = scmp.ne.s32.totalorder %s1079_s30, %s805_s28  ;;  %p813_p3 = scmp.lt.s32.totalorder %s1079_s30, %s1079_s30 }
  0x36   : > { %p814_p5 = scmp.lt.s32.totalorder %s812_s16, %s805_s28 }
  0x37   : > { %p808_p9 = pnand %p806_p6, %p1091_p0 }
  0x38   : > { %p815_p7 = por %p814_p5, %p813_p3 }
  0x39   : > { %p809_p13 = pneg %p808_p9 }
  0x3b   : > { %p816_p11 = pnand %p815_p7, %p809_p13 }
  0x3d   : > { %819 = shalt.err (!%p816_p11)
}
  0x3e   : > { %701 = dma.hbm_to_vmem [thread:$0]  (!%p1075_p12), %s1323_s2, 16, %s1079_s30, [#allocation6]  }
  0x3f   : > { %s820_s7 = scalar_lea.hbm %s1324_s3, 2048 }
  0x40   : > { %p821_p8 = scmp.ne.s32.totalorder %s1324_s3, %s820_s7  ;;  %p827_p1 = scmp.lt.u32.totalorder %s820_s7, %s1324_s3 }
  0x42   : > { %p823_p10 = pnand %p821_p8, %p1091_p0 }
  0x44   : > { %p824_p2 = pneg %p823_p10 }
  0x46   : > { %p829_p4 = pnand %p827_p1, %p824_p2 }
  0x48   : > { %832 = shalt.err (!%p829_p4)
}
  0x49   : > { %s833_s30 = scalar_lea.vmem %s1081_s8, 2048  ;;  %p841_p3 = scmp.lt.s32.totalorder %s1081_s8, %s1081_s8 }
  0x4a   : > { %p834_p6 = scmp.ne.s32.totalorder %s1081_s8, %s833_s30  ;;  %p842_p5 = scmp.lt.s32.totalorder %s833_s30, %s833_s30 }
  0x4c   : > { %p836_p9 = pnand %p834_p6, %p1091_p0  ;;  %p843_p7 = por %p842_p5, %p841_p3 }
  0x4e   : > { %p837_p13 = pneg %p836_p9 }
  0x50   : > { %p844_p11 = pnand %p843_p7, %p837_p13 }
  0x52   : > { %847 = shalt.err (!%p844_p11)
}
  0x53   : > { %s987_s13 = smov 128   ;;  %s988_s14 = smov 8  }
  0x54   : > { %704 = dma.hbm_to_vmem [thread:$0]  (!%p1075_p12), %s1324_s3, 2048, %s1081_s8, [#allocation9], %s987_s13, %s987_s13, %s988_s14  }
  0x55   : > { %s1158_s16 = sadd.s32 1, %s982_s21   ;;  %s32_s23 = sadd.s32 1, %s978_s20 }
  0x56   : > { %s29_s17 = ssub.s32 %s982_s21, %s1158_s16  ;;  %p39_p8 = scmp.ne.s32.totalorder %s978_s20, %s974_s19 }
  0x57   : > { %p30_p0 = scmp.eq.s32.totalorder %s29_s17, 0  ;;  %p40_p10 = scmp.eq.s32.totalorder %s982_s21, 0 }
  0x58   : > { %p716_p2 = scmp.lt.s32.totalorder %s982_s21, 2  ;;  %p1335_p4 = scmp.eq.s32.totalorder %s1046_s22, 1 }
  0x59   : > { %s1168_s27 = scalar_select %p30_p0, %s978_s20, %s32_s23  }
  0x5a   : > { %p41_p1 = por %p40_p10, %p39_p8  ;;  %p1172_p6 = por %p1335_p4, %p39_p8 }
  0x5b   : > { %s214_s29 = sand.u32 1, %s978_s20   ;;  %s588_s7 = sshll.u32 %s982_s21, 8 }
  0x5c   : > { %s569_s8 = sshll.u32 %s214_s29, 4  ;;  %s1181_s11 = scalar_lea.hbm %s1321_s0, %s588_s7 }
  0x5d   : > { %s218_s12 = scalar_lea.vmem [#allocation2], %s569_s8  ;;  %p1183_p12 = pnand %p716_p2, %p41_p1 }
  0x5e   : > { %s225_s30 = sshll.u32 %s218_s12, 4  ;;  %s1189_s28 = scalar_lea.sflag [#allocation3], %s214_s29  ;;  %s1187_s30 = int_to_ptr.vmem [resolvable:$true] %s225_s30 }
  0x5f   : > { %s848_s17 = scalar_lea.hbm %s1181_s11, 256  ;;  %p850_p13 = pneg %p1183_p12 }
  0x60   : > { %p849_p9 = scmp.ne.s32.totalorder %s1181_s11, %s848_s17  ;;  %s853_s8 = scalar_lea.hbm %s1321_s0, 512 }
  0x61   : > { %p854_p7 = scmp.lt.u32.totalorder %s1181_s11, %s1321_s0  ;;  %p855_p11 = scmp.lt.u32.totalorder %s853_s8, %s848_s17 }
  0x62   : > { %p851_p3 = pnand %p850_p13, %p849_p9  ;;  %p857_p8 = scmp.lt.u32.totalorder %s848_s17, %s1181_s11 }
  0x63   : > { %p856_p0 = por %p855_p11, %p854_p7 }
  0x64   : > { %p852_p5 = pneg %p851_p3 }
  0x65   : > { %p858_p10 = por %p857_p8, %p856_p0 }
  0x67   : > { %p859_p2 = pnand %p858_p10, %p852_p5 }
  0x69   : > { %862 = shalt.err (!%p859_p2)
}
  0x6a   : > { %s863_s29 = scalar_lea.vmem %s1187_s30, 256  ;;  %s989_s12 = smov [#allocation2]  }
  0x6b   : > { %p864_p1 = scmp.ne.s32.totalorder %s1187_s30, %s863_s29  ;;  %s868_s23 = sshll.u32 %s989_s12, 4  ;;  %s869_s23 = int_to_ptr.vmem [resolvable:$false] %s868_s23 }
  0x6c   : > { %s870_s7 = scalar_lea.vmem %s869_s23, 512  ;;  %p871_p3 = scmp.lt.s32.totalorder %s1187_s30, %s869_s23 }
  0x6d   : > { %p866_p4 = pnand %p864_p1, %p850_p13  ;;  %p872_p7 = scmp.lt.s32.totalorder %s870_s7, %s863_s29 }
  0x6f   : > { %p867_p9 = pneg %p866_p4  ;;  %p873_p11 = por %p872_p7, %p871_p3 }
  0x71   : > { %p874_p0 = pnand %p873_p11, %p867_p9 }
  0x73   : > { %877 = shalt.err (!%p874_p0)
}
  0x74   : > { %708 = dma.hbm_to_vmem [thread:$0]  (!%p1183_p12), %s1181_s11, 256, %s1187_s30, %s1189_s28, %s987_s13, %s987_s13, %s988_s14  }
  0x75   : > { %p1338_p13 = scmp.ne.s32.totalorder %s1332_s26, 0 }
  0x76   : > { %s1223_s17 = sand.u32 (!%p1338_p13), 1, %s974_s19   ;;  %p1339_p5 = scmp.ne.s32.totalorder (!%p1338_p13), %s1330_s24, 0 }
  0x77   : > { %237 = sbr.rel (%p1338_p13) target bundleno = 437 (0x1b5), region = 36  ;;  %s573_s8 = sshll.u32 (!%p1338_p13), %s1223_s17, 4 }
  0x78   : > { %s240_s9 = scalar_lea.sflag (!%p1338_p13), [#allocation3], %s1223_s17  ;;  %s1229_s15 = scalar_lea.vmem (!%p1338_p13), [#allocation2], %s573_s8 }
  0x7e   : > { %949 = dma.done.wait (%p1339_p5), %s240_s9, 256  }
  0x7f   : > { %951 = vsyncadd (%p1339_p5), %s240_s9, 4294967040  ;;  %p1340_p12 = scmp.eq.s32.totalorder %s1046_s22, 0 }
  0x81   : > { %953 = dma.done.wait (%p1340_p12), [#allocation6], 32   ;;  %p1341_p8 = pmov %p1340_p12 }
  0x83   : > { %955 = vsyncadd (%p1341_p8), [#allocation6], 4294967264  ;;  %p1342_p10 = pmov %p1341_p8 }
  0x84   : > { %p1343_p2 = pmov %p1341_p8 }
  0x85   : > { %957 = dma.done.wait (%p1342_p10), [#allocation9], 2048  }
  0x86   : > { %959 = vsyncadd (%p1343_p2), [#allocation9], 4294965248  ;;  %v306_v0 = vld [vmem:[#allocation8] sm:$0xff]  ;;  %v307_v1 = vld [vmem:[#allocation8 + $0x8] sm:$0xff]  ;;  %s279_s24 = scalar_lea.vmem [#allocation10], %s573_s8  ;;  %p1344_p1 = scmp.ne.s32.totalorder %s1046_s22, 0 }
  0x87   : > { %v308_v2 = vld [vmem:[#allocation8 + $0x10] sm:$0xff]  ;;  %v643_v3 = vpack.c.bf16 %v307_v1, %v306_v0  ;;  %v309_v4 = vld [vmem:[#allocation8 + $0x18] sm:$0xff]  ;;  %v310_v6 = vld [vmem:[#allocation8 + $0x20] sm:$0xff]  ;;  %v990_v36 = vmov (!%p1344_p1), 0.0  }
  0x88   : > { %v647_v5 = vpack.c.bf16 %v309_v4, %v308_v2  ;;  %v311_v7 = vld [vmem:[#allocation8 + $0x28] sm:$0xff]  ;;  %v312_v9 = vld [vmem:[#allocation8 + $0x30] sm:$0xff]  ;;  %v313_v11 = vld [vmem:[#allocation8 + $0x38] sm:$0xff]  ;;  %403 = vst [vmem:[#allocation11] sm:$0x3] (!%p1344_p1), %v990_v36 }
  0x89   : > { %644 = vmatprep.subr.bf16.mxu0 %v643_v3  ;;  %v651_v8 = vpack.c.bf16 %v311_v7, %v310_v6  ;;  %v284_v10 = vld [vmem:[%s1229_s15] sm:$0xff]  ;;  %v655_v15 = vpack.c.bf16 %v313_v11, %v312_v9  ;;  %v285_v26 = vld [vmem:[%s1229_s15 + $0x8] sm:$0xff] }
  0x8a   : > { %646 = vmatpush3.bf16.msra.mxu0 %v643_v3  ;;  %v578_v12 = vld [vmem:[#allocation5] ss:$0 sm:$0xff]  ;;  %v579_v13 = vld [vmem:[#allocation7] ss:$0 sm:$0xff]  ;;  %v314_v17 = vld [vmem:[#allocation8 + $0x40] sm:$0xff] }
  0x8b   : > { %648 = vmatprep.subr.bf16.mxu0 %v647_v5  ;;  %v293_v14 = vmul.f32 %v578_v12, %v284_v10  ;;  %v315_v18 = vld [vmem:[#allocation8 + $0x48] sm:$0xff]  ;;  %v316_v21 = vld [vmem:[#allocation8 + $0x50] sm:$0xff]  ;;  %v317_v22 = vld [vmem:[#allocation8 + $0x58] sm:$0xff]  ;;  %v294_v30 = vmul.f32 %v578_v12, %v285_v26 }
  0x8c   : > { %v659_v20 = vpack.c.bf16 %v315_v18, %v314_v17  ;;  %v663_v23 = vpack.c.bf16 %v317_v22, %v316_v21  ;;  %v318_v24 = vld [vmem:[#allocation8 + $0x60] sm:$0xff]  ;;  %v319_v25 = vld [vmem:[#allocation8 + $0x68] sm:$0xff]  ;;  %v320_v28 = vld [vmem:[#allocation8 + $0x70] sm:$0xff] }
  0x8d   : > { %v302_v16 = vadd.f32 %v579_v13, %v293_v14  ;;  %v667_v27 = vpack.c.bf16 %v319_v25, %v318_v24  ;;  %v321_v29 = vld [vmem:[#allocation8 + $0x78] sm:$0xff]  ;;  %v303_v32 = vadd.f32 %v579_v13, %v294_v30 }
  0x8e   : > { %650 = vmatpush3.bf16.msra.mxu0 %v647_v5  ;;  %v671_v31 = vpack.c.bf16 %v321_v29, %v320_v28 }
  0x8f   : > { %652 = vmatprep.subr.bf16.mxu0 %v651_v8  ;;  %v304_v19 = vmax.f32 %v302_v16, 0.0  ;;  %v305_v33 = vmax.f32 %v303_v32, 0.0 }
  0x91   : > { %640 = vmatprep.mubr.f32.mxu0 %v304_v19 }
  0x92   : > { %654 = vmatpush3.bf16.msra.mxu0 %v651_v8 }
  0x93   : > { %656 = vmatprep.subr.bf16.mxu0 %v655_v15 }
  0x96   : > { %658 = vmatpush3.bf16.msra.mxu0 %v655_v15 }
  0x97   : > { %660 = vmatprep.subr.bf16.mxu0 %v659_v20 }
  0x9a   : > { %662 = vmatpush3.bf16.msra.mxu0 %v659_v20 }
  0x9b   : > { %664 = vmatprep.subr.bf16.mxu0 %v663_v23 }
  0x9e   : > { %666 = vmatpush3.bf16.msra.mxu0 %v663_v23 }
  0x9f   : > { %668 = vmatprep.subr.bf16.mxu0 %v667_v27 }
  0xa2   : > { %670 = vmatpush3.bf16.msra.mxu0 %v667_v27 }
  0xa3   : > { %672 = vmatprep.subr.bf16.mxu0 %v671_v31 }
  0xa6   : > { %674 = vmatpush3.bf16.msra.mxu0 %v671_v31 }
  0xa9   : > { %641 = vmatmul.mubr.f32.vlgmr.msra.gmra.mrb[0].mxu0 %v305_v33 }
 0x178   : > { %402 = sbr.rel (%p1344_p1) target bundleno = 383 (0x17f), region = 56 }
 0x17c   : > { %v642_v34 = vpop.f32.mrb[0].mxu0 }
 0x17d   : > { %398 = vst [vmem:[%s279_s24 + $0x8] sm:$0xff] %v642_v34  ;;  %v388_v35 = vpop.f32.mrb[1].mxu0 }
 0x17e   : > { %397 = vst [vmem:[%s279_s24] sm:$0xff] %v388_v35 }
 0x17f PF: > { %v405_v37 = vadd.f32 %v642_v34, %v388_v35  ;;  %v412_v38 = vmul.f32 %v388_v35, %v388_v35  ;;  %v413_v39 = vmul.f32 %v642_v34, %v642_v34  ;;  %s589_s26 = sshll.u32 %s1046_s22, 8  ;;  %s439_s30 = sshll.u32 %s279_s24, 4  ;;  %s1255_s30 = int_to_ptr.vmem [resolvable:$true] %s439_s30 }
 0x180   : > { %s1253_s11 = scalar_lea.hbm %s1325_s4, %s589_s26  ;;  %s426_s28 = scalar_lea.sflag [#allocation4], %s1223_s17 }
 0x181   : > { %v406_v40 = vrot.slane %v405_v37, 4  ;;  %v414_v41 = vadd.f32 %v413_v39, %v412_v38  ;;  %s878_s10 = scalar_lea.vmem %s1255_s30, 256  ;;  %s991_s29 = smov [#allocation10]  }
 0x182   : > { %p879_p4 = scmp.ne.s32.totalorder %s1255_s30, %s878_s10  ;;  %s882_s12 = sshll.u32 %s991_s29, 4  ;;  %s883_s12 = int_to_ptr.vmem [resolvable:$false] %s882_s12 }
 0x183   : > { %v407_v42 = vadd.f32 %v406_v40, %v405_v37  ;;  %v415_v43 = vrot.slane %v414_v41, 4  ;;  %s884_s23 = scalar_lea.vmem %s883_s12, 512  ;;  %p885_p7 = scmp.lt.s32.totalorder %s1255_s30, %s883_s12 }
 0x184   : > { %p880_p9 = pnand %p879_p4, %p1172_p6  ;;  %p886_p11 = scmp.lt.s32.totalorder %s884_s23, %s878_s10 }
 0x186   : > { %p881_p3 = pneg %p880_p9  ;;  %p887_p0 = por %p886_p11, %p885_p7 }
 0x188   : > { %p888_p13 = pnand %p887_p0, %p881_p3 }
 0x18a   : > { %891 = shalt.err (!%p888_p13)
}
 0x18b   : > { %s892_s7 = scalar_lea.hbm %s1253_s11, 256  ;;  %s896_s15 = scalar_lea.hbm %s1325_s4, 512 }
 0x18c   : > { %p893_p5 = scmp.ne.s32.totalorder %s1253_s11, %s892_s7  ;;  %p897_p10 = scmp.lt.u32.totalorder %s1253_s11, %s1325_s4 }
 0x18d   : > { %p898_p2 = scmp.lt.u32.totalorder %s896_s15, %s892_s7  ;;  %p900_p4 = scmp.lt.u32.totalorder %s892_s7, %s1253_s11 }
 0x18e   : > { %p894_p12 = pnand %p893_p5, %p1172_p6 }
 0x18f   : > { %p899_p1 = por %p898_p2, %p897_p10 }
 0x190   : > { %p895_p8 = pneg %p894_p12 }
 0x191   : > { %p901_p9 = por %p900_p4, %p899_p1 }
 0x193   : > { %p902_p3 = pnand %p901_p9, %p895_p8 }
 0x195   : > { %905 = shalt.err (!%p902_p3)
}
 0x196   : > { %s992_s13 = smov 128   ;;  %s993_s14 = smov 8   ;;  %v408_v44 = vrot.slane %v407_v42, 2  ;;  %v416_v45 = vadd.f32 %v415_v43, %v414_v41  ;;  %vm421_vm0 = vcmask 1040384   ;;  %v404_v52 = vld [vmem:[#allocation11] sm:$0x3] }
 0x197   : > { %689 = dma.vmem_to_hbm [thread:$0]  (%p1172_p6), %s1255_s30, 256, %s1253_s11, %s426_s28, %s992_s13, %s992_s13, %s993_s14  }
 0x198   : > { %v409_v46 = vadd.f32 %v408_v44, %v407_v42  ;;  %v417_v47 = vrot.slane %v416_v45, 2  ;;  %s994_s10 = smov [#allocation11]   ;;  %p1345_p7 = scmp.eq.s32.totalorder %s1046_s22, 1 }
 0x199   : > { %s453_s29 = sshll.u32 %s994_s10, 4  ;;  %s454_s29 = int_to_ptr.vmem [resolvable:$true] %s453_s29 }
 0x19a   : > { %v410_v48 = vrot.slane %v409_v46, 1  ;;  %v418_v49 = vadd.f32 %v417_v47, %v416_v45  ;;  %s906_s6 = scalar_lea.vmem %s454_s29, 32  ;;  %p913_p13 = scmp.lt.s32.totalorder %s454_s29, %s454_s29 }
 0x19b   : > { %p907_p6 = scmp.ne.s32.totalorder %s454_s29, %s906_s6  ;;  %p914_p5 = scmp.lt.s32.totalorder %s906_s6, %s906_s6 }
 0x19c   : > { %v411_v50 = vadd.f32 %v410_v48, %v409_v46  ;;  %v419_v51 = vrot.slane %v418_v49, 1 }
 0x19d   : > { %p908_p11 = pnand %p907_p6, %p1345_p7  ;;  %p915_p12 = por %p914_p5, %p913_p13 }
 0x19e   : > { %v420_v53 = vadd.f32 %v419_v51, %v418_v49 }
 0x19f   : > { %p909_p0 = pneg %p908_p11 }
 0x1a0   : > { %v422_v54 = vsel %vm421_vm0, %v411_v50, %v420_v53 }
 0x1a1   : > { %v423_v55 = vadd.f32 %v422_v54, %v404_v52  ;;  %p916_p8 = pnand %p915_p12, %p909_p0 }
 0x1a3   : > { %424 = vst [vmem:[#allocation11] sm:$0x3] %v423_v55 }
 0x1a4   : > { %919 = shalt.err (!%p916_p8)
}
 0x1a5   : > { %s920_s30 = scalar_lea.hbm %s1326_s5, 32  ;;  %p1346_p2 = pmov %p1345_p7 }
 0x1a6   : > { %p921_p10 = scmp.ne.s32.totalorder %s1326_s5, %s920_s30  ;;  %p926_p9 = scmp.lt.u32.totalorder %s920_s30, %s1326_s5 }
 0x1a8   : > { %p922_p1 = pnand %p921_p10, %p1346_p2 }
 0x1aa   : > { %p923_p4 = pneg %p922_p1 }
 0x1ac   : > { %p928_p3 = pnand %p926_p9, %p923_p4 }
 0x1ae   : > { %931 = shalt.err (!%p928_p3)
}
 0x1af   : > { %p1347_p6 = pmov %p1346_p2  ;;  %p1348_p7 = pmov %p1346_p2 }
 0x1b1   : > { %691 = dma.vmem_to_hbm [thread:$0]  (%p1347_p6), %s454_s29, 32, %s1326_s5, [#allocation12]  }
 0x1b2   : > { %961 = dma.done.wait (%p1348_p7), [#allocation12], 32   ;;  %p1349_p11 = pmov %p1346_p2 }
 0x1b4   : > { %963 = vsyncadd (%p1349_p11), [#allocation12], 4294967264 }
 0x1b5 PF: > { %s469_s15 = sand.u32 1, %s970_s18   ;;  %p1350_p0 = scmp.ne.s32.totalorder %s1331_s25, 0 }
 0x1b6   : > { %p1351_p13 = scmp.ge.s32.totalorder %s982_s21, 2  ;;  %s470_s24 = scalar_lea.sflag [#allocation4], %s469_s15 }
 0x1b8   : > { %p710_p5 = pnand %p1351_p13, %p1350_p0 }
 0x1ba   : > { %965 = dma.done.wait (!%p710_p5), %s470_s24, 256  }
 0x1bb   : > { %967 = vsyncadd (!%p710_p5), %s470_s24, 4294967040  ;;  %p22_p12 = scmp.ge.s32.totalorder %s1158_s16, 4   ;;  %s1352_s18 = smov %s974_s19 }
 0x1bc   : > { %s1353_s19 = smov %s978_s20  ;;  %s1354_s20 = smov %s1168_s27 }
 0x1bd   : > { %s1355_s21 = smov %s1158_s16  ;;  %24 = sbr.rel (!%p22_p12) target bundleno = 8 (0x8), region = 105 }
 0x1c4   :  { %475 = vsyncpa [#allocation3], 1 }
 0x1c5   :  { %477 = vsyncpa [#allocation3 + $0x1], 1 }
 0x1c6   :  { %478 = vsyncpa [#allocation6], 1 }
 0x1c7   :  { %479 = vsyncpa [#allocation9], 1 }
 0x1c8   :  { %480 = vsyncpa [#allocation4], 1 }
 0x1c9   :  { %482 = vsyncpa [#allocation4 + $0x1], 1 }
 0x1ca   :  { %483 = vsyncpa [#allocation12], 1 }

// kernel: bottleneck_forward.7
= control target key start
LH: loop header
LB: loop body
LE: loop exit
PB: predicated region body
PF: predicated region fallthrough
CT: control target
= control target key end

     0   :  { %s1321_s0 = inlined_call_operand.hbm [shape: f32[32,128], index: 0, kind: input, shape index: {}]   ;;  %s1322_s1 = inlined_call_operand.hbm [shape: f32[32,128], index: 1, kind: input, shape index: {}]   ;;  %s1323_s2 = inlined_call_operand.hbm [shape: f32[1,128], index: 2, kind: input, shape index: {}]   ;;  %s1324_s3 = inlined_call_operand.hbm [shape: f32[1,128], index: 3, kind: input, shape index: {}]   ;;  %s1325_s4 = inlined_call_operand.hbm [shape: f32[1,128], index: 4, kind: input, shape index: {}]   ;;  %s1326_s5 = inlined_call_operand.hbm [shape: f32[1,128], index: 5, kind: input, shape index: {}]   ;;  %s1327_s6 = inlined_call_operand.hbm [shape: f32[32,128], index: 6, kind: output, shape index: {}]  }
   0x1   :  { %1331 = sst [smem:[#allocation20_spill]] %s1321_s0 }
   0x2   :  { %1332 = sst [smem:[#allocation21_spill]] %s1323_s2 }
   0x3   :  { %1333 = sst [smem:[#allocation22_spill]] %s1324_s3 }
   0x4   :  { %11 = vsyncpa [#allocation3], 0 }
   0x5   :  { %13 = vsyncpa [#allocation3 + $0x1], 0 }
   0x6   :  { %14 = vsyncpa [#allocation6], 0 }
   0x7   :  { %16 = vsyncpa [#allocation6 + $0x1], 0 }
   0x8   :  { %17 = vsyncpa [#allocation9], 0 }
   0x9   :  { %18 = vsyncpa [#allocation12], 0 }
   0xa   :  { %19 = vsyncpa [#allocation4], 0 }
   0xb   :  { %21 = vsyncpa [#allocation4 + $0x1], 0  ;;  %s988_s21 = smov 0   ;;  %s990_s22 = smov 0  }
   0xc   :  { %s992_s23 = smov 0   ;;  %s994_s24 = smov 0  }
   0xd LB: > { %s1009_s25 = sadd.s32 4294967295, %s940_s24   ;;  %s557_s26 = sadd.s32 4294967294, %s940_s24   ;;  %s940_s24 = sphi %s994_s24, %s1358_s24   ;;  %s936_s23 = sphi %s992_s23, %s1357_s23   ;;  %s932_s22 = sphi %s990_s22, %s1356_s22   ;;  %s928_s21 = sphi %s988_s21, %s1355_s21  }
   0xe   : > { %p47_p0 = scmp.ne.s32.totalorder %s932_s22, %s928_s21  ;;  %p1328_p1 = scmp.eq.s32.totalorder %s1009_s25, 0 }
   0xf   : > { %p187_p3 = scmp.eq.s32.totalorder %s557_s26, 1  ;;  %p558_p5 = scmp.ge.s32.totalorder %s940_s24, 1 }
  0x10   : > { %p1018_p4 = por %p1328_p1, %p47_p0  ;;  %p194_p7 = scmp.lt.s32.totalorder %s940_s24, 3 }
  0x11   : > { %p1023_p6 = por %p187_p3, %p47_p0  ;;  %s942_s30 = smov [#allocation7]  }
  0x12   : > { %s1334_s27 = scalar_select %p1018_p4, 1, 0 }
  0x13   : > { %s1335_s28 = scalar_select %p1023_p6, 1, 0 }
  0x14   : > { %p1028_p8 = pnand %p558_p5, %p194_p7  ;;  %s207_s7 = sshll.u32 %s942_s30, 4  ;;  %s208_s7 = int_to_ptr.vmem [resolvable:$true] %s207_s7 }
  0x15   : > { %s943_s8 = smov [#allocation8]   ;;  %s944_s11 = smov [#allocation10]  }
  0x16   : > { %s1336_s29 = scalar_select %p1028_p8, 1, 0 }
  0x17   : > { %p612_p10 = pneg %p1028_p8  ;;  %s218_s9 = sshll.u32 %s943_s8, 4  ;;  %s1041_s9 = int_to_ptr.vmem [resolvable:$true] %s218_s9 }
  0x18   : > { %s229_s12 = sshll.u32 %s944_s11, 4  ;;  %s1338_s2 = sld [smem:[#allocation21_spill]]  ;;  %s1043_s12 = int_to_ptr.vmem [resolvable:$true] %s229_s12 }
  0x19   : > { %p1037_p11 = pnand %p612_p10, %p1328_p1 }
  0x1b   : > { %p1053_p13 = pneg %p1037_p11 }
  0x1e   : > { %s686_s15 = scalar_lea.hbm %s1338_s2, 16 }
  0x1f   : > { %p687_p12 = scmp.ne.s32.totalorder %s1338_s2, %s686_s15  ;;  %p693_p5 = scmp.lt.u32.totalorder %s686_s15, %s1338_s2 }
  0x21   : > { %p689_p0 = pnand %p1053_p13, %p687_p12 }
  0x23   : > { %p690_p3 = pneg %p689_p0 }
  0x25   : > { %p695_p7 = pnand %p693_p5, %p690_p3 }
  0x27   : > { %698 = shalt.err (!%p695_p7)
}
  0x28   : > { %s699_s26 = scalar_lea.vmem %s208_s7, 16  ;;  %s706_s30 = scalar_lea.vmem %s208_s7, 32 }
  0x29   : > { %p700_p10 = scmp.ne.s32.totalorder %s208_s7, %s699_s26  ;;  %p707_p2 = scmp.lt.s32.totalorder %s208_s7, %s208_s7 }
  0x2a   : > { %p708_p6 = scmp.lt.s32.totalorder %s706_s30, %s699_s26 }
  0x2b   : > { %p702_p9 = pnand %p700_p10, %p1053_p13 }
  0x2c   : > { %p709_p4 = por %p708_p6, %p707_p2 }
  0x2d   : > { %p703_p1 = pneg %p702_p9 }
  0x2f   : > { %p710_p8 = pnand %p709_p4, %p703_p1 }
  0x31   : > { %713 = shalt.err (!%p710_p8)
}
  0x32   : > { %615 = dma.hbm_to_vmem [thread:$0]  (!%p1037_p11), %s1338_s2, 16, %s208_s7, [#allocation6]  }
  0x33   : > { %s1340_s3 = sld [smem:[#allocation22_spill]] }
  0x39   : > { %s714_s15 = scalar_lea.hbm %s1340_s3, 16 }
  0x3a   : > { %p715_p9 = scmp.ne.s32.totalorder %s1340_s3, %s714_s15  ;;  %p721_p1 = scmp.lt.u32.totalorder %s714_s15, %s1340_s3 }
  0x3c   : > { %p717_p12 = pnand %p715_p9, %p1053_p13 }
  0x3e   : > { %p718_p2 = pneg %p717_p12 }
  0x40   : > { %p723_p4 = pnand %p721_p1, %p718_p2 }
  0x42   : > { %726 = shalt.err (!%p723_p4)
}
  0x43   : > { %s727_s7 = scalar_lea.vmem %s1041_s9, 16  ;;  %s734_s26 = scalar_lea.vmem %s1041_s9, 32 }
  0x44   : > { %p728_p6 = scmp.ne.s32.totalorder %s1041_s9, %s727_s7  ;;  %p735_p3 = scmp.lt.s32.totalorder %s1041_s9, %s1041_s9 }
  0x45   : > { %p736_p5 = scmp.lt.s32.totalorder %s734_s26, %s727_s7 }
  0x46   : > { %p730_p8 = pnand %p728_p6, %p1053_p13 }
  0x47   : > { %p737_p7 = por %p736_p5, %p735_p3 }
  0x48   : > { %p731_p0 = pneg %p730_p8 }
  0x4a   : > { %p738_p10 = pnand %p737_p7, %p731_p0 }
  0x4c   : > { %741 = shalt.err (!%p738_p10)
}
  0x4d   : > { %618 = dma.hbm_to_vmem [thread:$0]  (!%p1037_p11), %s1340_s3, 16, %s1041_s9, [#allocation9]  }
  0x4e   : > { %s742_s14 = scalar_lea.hbm %s1325_s4, 16 }
  0x4f   : > { %p743_p9 = scmp.ne.s32.totalorder %s1325_s4, %s742_s14  ;;  %p749_p1 = scmp.lt.u32.totalorder %s742_s14, %s1325_s4 }
  0x51   : > { %p745_p12 = pnand %p743_p9, %p1053_p13 }
  0x53   : > { %p746_p2 = pneg %p745_p12 }
  0x55   : > { %p751_p4 = pnand %p749_p1, %p746_p2 }
  0x57   : > { %754 = shalt.err (!%p751_p4)
}
  0x58   : > { %s755_s9 = scalar_lea.vmem %s1043_s12, 16  ;;  %s762_s20 = scalar_lea.vmem %s1043_s12, 32 }
  0x59   : > { %p756_p6 = scmp.ne.s32.totalorder %s1043_s12, %s755_s9  ;;  %p763_p3 = scmp.lt.s32.totalorder %s1043_s12, %s1043_s12 }
  0x5a   : > { %p764_p5 = scmp.lt.s32.totalorder %s762_s20, %s755_s9 }
  0x5b   : > { %p758_p8 = pnand %p756_p6, %p1053_p13 }
  0x5c   : > { %p765_p7 = por %p764_p5, %p763_p3 }
  0x5d   : > { %p759_p0 = pneg %p758_p8 }
  0x5f   : > { %p766_p10 = pnand %p765_p7, %p759_p0 }
  0x61   : > { %769 = shalt.err (!%p766_p10)
}
  0x62   : > { %621 = dma.hbm_to_vmem [thread:$0]  (!%p1037_p11), %s1325_s4, 16, %s1043_s12, [#allocation9]  }
  0x63   : > { %s945_s30 = smov [#allocation11]   ;;  %s770_s14 = scalar_lea.hbm %s1326_s5, 16 }
  0x64   : > { %s240_s8 = sshll.u32 %s945_s30, 4  ;;  %p771_p9 = scmp.ne.s32.totalorder %s1326_s5, %s770_s14  ;;  %s241_s8 = int_to_ptr.vmem [resolvable:$true] %s240_s8 }
  0x65   : > { %p777_p1 = scmp.lt.u32.totalorder %s770_s14, %s1326_s5 }
  0x66   : > { %p773_p12 = pnand %p771_p9, %p1053_p13 }
  0x68   : > { %p774_p2 = pneg %p773_p12 }
  0x6a   : > { %p779_p4 = pnand %p777_p1, %p774_p2 }
  0x6c   : > { %782 = shalt.err (!%p779_p4)
}
  0x6d   : > { %s783_s12 = scalar_lea.vmem %s241_s8, 16  ;;  %s790_s9 = scalar_lea.vmem %s241_s8, 32 }
  0x6e   : > { %p784_p6 = scmp.ne.s32.totalorder %s241_s8, %s783_s12  ;;  %p791_p3 = scmp.lt.s32.totalorder %s241_s8, %s241_s8 }
  0x6f   : > { %p792_p5 = scmp.lt.s32.totalorder %s790_s9, %s783_s12 }
  0x70   : > { %p786_p8 = pnand %p784_p6, %p1053_p13 }
  0x71   : > { %p793_p7 = por %p792_p5, %p791_p3 }
  0x72   : > { %p787_p0 = pneg %p786_p8 }
  0x74   : > { %p794_p10 = pnand %p793_p7, %p787_p0 }
  0x76   : > { %797 = shalt.err (!%p794_p10)
}
  0x77   : > { %624 = dma.hbm_to_vmem [thread:$0]  (!%p1037_p11), %s1326_s5, 16, %s241_s8, [#allocation12]  }
  0x78   : > { %s1136_s18 = sadd.s32 1, %s940_s24   ;;  %s34_s10 = sadd.s32 1, %s936_s23 }
  0x79   : > { %s31_s26 = ssub.s32 %s940_s24, %s1136_s18  ;;  %p41_p13 = scmp.ne.s32.totalorder %s936_s23, %s932_s22 }
  0x7a   : > { %p32_p9 = scmp.eq.s32.totalorder %s31_s26, 0  ;;  %p42_p12 = scmp.eq.s32.totalorder %s940_s24, 0 }
  0x7b   : > { %p1341_p2 = scmp.eq.s32.totalorder %s1009_s25, 1  ;;  %p640_p4 = scmp.lt.s32.totalorder %s940_s24, 2 }
  0x7c   : > { %s1152_s11 = scalar_select %p32_p9, %s936_s23, %s34_s10  }
  0x7d   : > { %p1146_p1 = por %p1341_p2, %p41_p13  ;;  %p43_p6 = por %p42_p12, %p41_p13 }
  0x7e   : > { %s251_s13 = sand.u32 1, %s936_s23   ;;  %s587_s8 = sshll.u32 %s940_s24, 8 }
  0x7f   : > { %s1155_s14 = sshll.u32 %s251_s13, 4  ;;  %s1343_s0 = sld [smem:[#allocation20_spill]] }
  0x80   : > { %s255_s19 = scalar_lea.vmem [#allocation2], %s1155_s14  ;;  %p1168_p11 = pnand %p640_p4, %p43_p6 }
  0x81   : > { %s262_s12 = sshll.u32 %s255_s19, 4  ;;  %s1172_s20 = scalar_lea.sflag [#allocation3], %s251_s13  ;;  %s1166_s12 = int_to_ptr.vmem [resolvable:$true] %s262_s12 }
  0x82   : > { %p800_p0 = pneg %p1168_p11 }
  0x85   : > { %s1163_s17 = scalar_lea.hbm %s1343_s0, %s587_s8  ;;  %s803_s15 = scalar_lea.hbm %s1343_s0, 512 }
  0x86   : > { %s798_s7 = scalar_lea.hbm %s1163_s17, 256  ;;  %p804_p7 = scmp.lt.u32.totalorder %s1163_s17, %s1343_s0 }
  0x87   : > { %p799_p8 = scmp.ne.s32.totalorder %s1163_s17, %s798_s7  ;;  %p805_p10 = scmp.lt.u32.totalorder %s803_s15, %s798_s7 }
  0x88   : > { %p807_p9 = scmp.lt.u32.totalorder %s798_s7, %s1163_s17 }
  0x89   : > { %p801_p3 = pnand %p800_p0, %p799_p8  ;;  %p806_p13 = por %p805_p10, %p804_p7 }
  0x8b   : > { %p802_p5 = pneg %p801_p3  ;;  %p808_p12 = por %p807_p9, %p806_p13 }
  0x8d   : > { %p809_p2 = pnand %p808_p12, %p802_p5 }
  0x8f   : > { %812 = shalt.err (!%p809_p2)
}
  0x90   : > { %s813_s13 = scalar_lea.vmem %s1166_s12, 256  ;;  %s946_s10 = smov [#allocation2]  }
  0x91   : > { %p814_p4 = scmp.ne.s32.totalorder %s1166_s12, %s813_s13  ;;  %s818_s26 = sshll.u32 %s946_s10, 4  ;;  %s819_s26 = int_to_ptr.vmem [resolvable:$false] %s818_s26 }
  0x92   : > { %s820_s16 = scalar_lea.vmem %s819_s26, 512  ;;  %p821_p3 = scmp.lt.s32.totalorder %s1166_s12, %s819_s26 }
  0x93   : > { %p816_p6 = pnand %p814_p4, %p800_p0  ;;  %p822_p7 = scmp.lt.s32.totalorder %s820_s16, %s813_s13 }
  0x95   : > { %p817_p8 = pneg %p816_p6  ;;  %p823_p10 = por %p822_p7, %p821_p3 }
  0x97   : > { %p824_p13 = pnand %p823_p10, %p817_p8 }
  0x99   : > { %827 = shalt.err (!%p824_p13)
}
  0x9a   : > { %s947_s7 = smov 128   ;;  %s948_s15 = smov 8  }
  0x9b   : > { %628 = dma.hbm_to_vmem [thread:$0]  (!%p1168_p11), %s1163_s17, 256, %s1166_s12, %s1172_s20, %s947_s7, %s947_s7, %s948_s15  }
  0x9c   : > { %s1208_s10 = scalar_lea.hbm %s1322_s1, %s587_s8  ;;  %s276_s26 = scalar_lea.vmem [#allocation5], %s1155_s14 }
  0x9d   : > { %s283_s16 = sshll.u32 %s276_s26, 4  ;;  %s272_s0 = sand.u32 1, %s940_s24   ;;  %s1211_s16 = int_to_ptr.vmem [resolvable:$true] %s283_s16 }
  0x9e   : > { %s1214_s2 = scalar_lea.sflag [#allocation6], %s272_s0  ;;  %s828_s3 = scalar_lea.hbm %s1208_s10, 256 }
  0x9f   : > { %p829_p5 = scmp.ne.s32.totalorder %s1208_s10, %s828_s3  ;;  %s833_s12 = scalar_lea.hbm %s1322_s1, 512 }
  0xa0   : > { %p834_p2 = scmp.lt.u32.totalorder %s1208_s10, %s1322_s1  ;;  %p835_p4 = scmp.lt.u32.totalorder %s833_s12, %s828_s3 }
  0xa1   : > { %p831_p9 = pnand %p829_p5, %p800_p0  ;;  %p837_p8 = scmp.lt.u32.totalorder %s828_s3, %s1208_s10 }
  0xa2   : > { %p836_p6 = por %p835_p4, %p834_p2 }
  0xa3   : > { %p832_p12 = pneg %p831_p9 }
  0xa4   : > { %p838_p3 = por %p837_p8, %p836_p6 }
  0xa6   : > { %p839_p7 = pnand %p838_p3, %p832_p12 }
  0xa8   : > { %842 = shalt.err (!%p839_p7)
}
  0xa9   : > { %s843_s0 = scalar_lea.vmem %s1211_s16, 256  ;;  %s949_s14 = smov [#allocation5]  }
  0xaa   : > { %p844_p10 = scmp.ne.s32.totalorder %s1211_s16, %s843_s0  ;;  %s848_s13 = sshll.u32 %s949_s14, 4  ;;  %s849_s13 = int_to_ptr.vmem [resolvable:$false] %s848_s13 }
  0xab   : > { %s850_s26 = scalar_lea.vmem %s849_s13, 512  ;;  %p851_p9 = scmp.lt.s32.totalorder %s1211_s16, %s849_s13 }
  0xac   : > { %p846_p13 = pnand %p844_p10, %p800_p0  ;;  %p852_p2 = scmp.lt.s32.totalorder %s850_s26, %s843_s0 }
  0xae   : > { %p847_p5 = pneg %p846_p13  ;;  %p853_p4 = por %p852_p2, %p851_p9 }
  0xb0   : > { %p854_p6 = pnand %p853_p4, %p847_p5 }
  0xb2   : > { %857 = shalt.err (!%p854_p6)
}
  0xb3   : > { %631 = dma.hbm_to_vmem [thread:$0]  (!%p1168_p11), %s1208_s10, 256, %s1211_s16, %s1214_s2, %s947_s7, %s947_s7, %s948_s15  }
  0xb4   : > { %p1345_p0 = scmp.ne.s32.totalorder %s1336_s29, 0 }
  0xb5   : > { %s1246_s3 = sand.u32 (!%p1345_p0), 1, %s932_s22   ;;  %p1346_p12 = scmp.ne.s32.totalorder (!%p1345_p0), %s1334_s27, 0 }
  0xb6   : > { %295 = sbr.rel (%p1345_p0) target bundleno = 230 (0xe6), region = 44  ;;  %s571_s17 = sshll.u32 (!%p1345_p0), %s1246_s3, 4 }
  0xb7   : > { %s298_s8 = scalar_lea.sflag (!%p1345_p0), [#allocation3], %s1246_s3  ;;  %s301_s12 = scalar_lea.vmem (!%p1345_p0), [#allocation2], %s571_s17 }
  0xbd   : > { %903 = dma.done.wait (%p1346_p12), %s298_s8, 256  }
  0xbe   : > { %905 = vsyncadd (%p1346_p12), %s298_s8, 4294967040  ;;  %s306_s2 = sand.u32 1, %s1009_s25   ;;  %s310_s29 = scalar_lea.vmem [#allocation5], %s571_s17 }
  0xbf   : > { %s307_s9 = scalar_lea.sflag [#allocation6], %s306_s2 }
  0xc0   : > { %907 = dma.done.wait (%p1346_p12), %s307_s9, 256  }
  0xc1   : > { %909 = vsyncadd (%p1346_p12), %s307_s9, 4294967040  ;;  %p1347_p11 = scmp.eq.s32.totalorder %s1009_s25, 0 }
  0xc3   : > { %911 = dma.done.wait (%p1347_p11), [#allocation6], 16   ;;  %p1348_p8 = pmov %p1347_p11 }
  0xc5   : > { %913 = vsyncadd (%p1348_p8), [#allocation6], 4294967280  ;;  %p1349_p3 = pmov %p1348_p8 }
  0xc7   : > { %915 = dma.done.wait (%p1349_p3), [#allocation9], 32   ;;  %p1350_p7 = pmov %p1349_p3 }
  0xc8   : > { %p1351_p10 = pmov %p1349_p3 }
  0xc9   : > { %917 = vsyncadd (%p1350_p7), [#allocation9], 4294967264 }
  0xca   : > { %919 = dma.done.wait (%p1351_p10), [#allocation12], 16   ;;  %p1352_p13 = pmov %p1349_p3 }
  0xcb   : > { %v363_v0 = vld [vmem:[%s301_s12] sm:$0xff]  ;;  %v364_v8 = vld [vmem:[%s301_s12 + $0x8] sm:$0xff]  ;;  %s359_s27 = scalar_lea.vmem [#allocation13], %s571_s17  ;;  %s589_s15 = sshll.u32 %s1009_s25, 8 }
  0xcc   : > { %921 = vsyncadd (%p1352_p13), [#allocation12], 4294967280  ;;  %v578_v1 = vld [vmem:[#allocation7] ss:$0 sm:$0xff]  ;;  %v579_v2 = vld [vmem:[#allocation8] ss:$0 sm:$0xff]  ;;  %s1277_s20 = scalar_lea.hbm %s1327_s6, %s589_s15 }
  0xcd   : > { %v372_v3 = vmul.f32 %v578_v1, %v363_v0  ;;  %v383_v4 = vld [vmem:[%s310_s29] sm:$0xff]  ;;  %v384_v9 = vld [vmem:[%s310_s29 + $0x8] sm:$0xff]  ;;  %v373_v11 = vmul.f32 %v578_v1, %v364_v8  ;;  %s423_s7 = sshll.u32 %s359_s27, 4  ;;  %s410_s19 = scalar_lea.sflag [#allocation4], %s1246_s3  ;;  %s1272_s7 = int_to_ptr.vmem [resolvable:$true] %s423_s7 }
  0xce   : > { %v580_v5 = vld [vmem:[#allocation10] ss:$0 sm:$0xff]  ;;  %v581_v6 = vld [vmem:[#allocation11] ss:$0 sm:$0xff]  ;;  %s858_s0 = scalar_lea.vmem %s1272_s7, 256  ;;  %s950_s25 = smov [#allocation13]  }
  0xcf   : > { %v392_v7 = vmul.f32 %v580_v5, %v383_v4  ;;  %v381_v10 = vadd.f32 %v579_v2, %v372_v3  ;;  %v393_v12 = vmul.f32 %v580_v5, %v384_v9  ;;  %v382_v14 = vadd.f32 %v579_v2, %v373_v11  ;;  %p859_p5 = scmp.ne.s32.totalorder %s1272_s7, %s858_s0  ;;  %s862_s14 = sshll.u32 %s950_s25, 4  ;;  %s863_s14 = int_to_ptr.vmem [resolvable:$false] %s862_s14 }
  0xd0   : > { %s864_s13 = scalar_lea.vmem %s863_s14, 512  ;;  %p865_p4 = scmp.lt.s32.totalorder %s1272_s7, %s863_s14 }
  0xd1   : > { %v401_v13 = vadd.f32 %v581_v6, %v392_v7  ;;  %v402_v15 = vadd.f32 %v581_v6, %v393_v12  ;;  %p860_p9 = pnand %p859_p5, %p1146_p1  ;;  %p866_p6 = scmp.lt.s32.totalorder %s864_s13, %s858_s0 }
  0xd3   : > { %v403_v16 = vadd.f32 %v401_v13, %v381_v10  ;;  %v404_v17 = vadd.f32 %v402_v15, %v382_v14  ;;  %p861_p2 = pneg %p860_p9  ;;  %p867_p0 = por %p866_p6, %p865_p4 }
  0xd5   : > { %v405_v18 = vmax.f32 %v403_v16, 0.0  ;;  %v406_v19 = vmax.f32 %v404_v17, 0.0  ;;  %p868_p12 = pnand %p867_p0, %p861_p2 }
  0xd7   : > { %407 = vst [vmem:[%s359_s27] sm:$0xff] %v405_v18  ;;  %408 = vst [vmem:[%s359_s27 + $0x8] sm:$0xff] %v406_v19 }
  0xd8   : > { %871 = shalt.err (!%p868_p12)
}
  0xd9   : > { %s872_s26 = scalar_lea.hbm %s1277_s20, 256  ;;  %s876_s12 = scalar_lea.hbm %s1327_s6, 512 }
  0xda   : > { %p873_p11 = scmp.ne.s32.totalorder %s1277_s20, %s872_s26  ;;  %p877_p7 = scmp.lt.u32.totalorder %s1277_s20, %s1327_s6 }
  0xdb   : > { %p878_p10 = scmp.lt.u32.totalorder %s876_s12, %s872_s26  ;;  %p880_p5 = scmp.lt.u32.totalorder %s872_s26, %s1277_s20 }
  0xdc   : > { %p874_p8 = pnand %p873_p11, %p1146_p1 }
  0xdd   : > { %p879_p13 = por %p878_p10, %p877_p7 }
  0xde   : > { %p875_p3 = pneg %p874_p8 }
  0xdf   : > { %p881_p9 = por %p880_p5, %p879_p13 }
  0xe1   : > { %p882_p2 = pnand %p881_p9, %p875_p3 }
  0xe3   : > { %885 = shalt.err (!%p882_p2)
}
  0xe4   : > { %s951_s29 = smov 128   ;;  %s952_s27 = smov 8  }
  0xe5   : > { %610 = dma.vmem_to_hbm [thread:$0]  (%p1146_p1), %s1272_s7, 256, %s1277_s20, %s410_s19, %s951_s29, %s951_s29, %s952_s27  }
  0xe6 PF: > { %s438_s15 = sand.u32 1, %s928_s21   ;;  %p1353_p4 = scmp.ne.s32.totalorder %s1335_s28, 0 }
  0xe7   : > { %p1354_p6 = scmp.ge.s32.totalorder %s940_s24, 2  ;;  %s439_s10 = scalar_lea.sflag [#allocation4], %s438_s15 }
  0xe9   : > { %p633_p0 = pnand %p1354_p6, %p1353_p4 }
  0xeb   : > { %923 = dma.done.wait (!%p633_p0), %s439_s10, 256  }
  0xec   : > { %925 = vsyncadd (!%p633_p0), %s439_s10, 4294967040  ;;  %p24_p12 = scmp.ge.s32.totalorder %s1136_s18, 4   ;;  %s1355_s21 = smov %s932_s22 }
  0xed   : > { %s1356_s22 = smov %s936_s23  ;;  %s1357_s23 = smov %s1152_s11 }
  0xee   : > { %s1358_s24 = smov %s1136_s18  ;;  %26 = sbr.rel (!%p24_p12) target bundleno = 13 (0xd), region = 118 }
  0xf5   :  { %444 = vsyncpa [#allocation3], 1 }
  0xf6   :  { %446 = vsyncpa [#allocation3 + $0x1], 1 }
  0xf7   :  { %447 = vsyncpa [#allocation6], 1 }
  0xf8   :  { %449 = vsyncpa [#allocation6 + $0x1], 1 }
  0xf9   :  { %450 = vsyncpa [#allocation9], 1 }
  0xfa   :  { %451 = vsyncpa [#allocation12], 1 }
  0xfb   :  { %452 = vsyncpa [#allocation4], 1 }
  0xfc   :  { %454 = vsyncpa [#allocation4 + $0x1], 1 }

</bundles_post_ra>
